<compile_context>
chip_gen: v5e
topology: v5e:2x2
jax: 0.10.0
libtpu: 0.0.40
codegen_flags: <defaults>
</compile_context>

<pallas_src>
import functools
from typing import NamedTuple

import numpy as np

import jax
import jax.numpy as jnp
from jax import lax
from jax.experimental import pallas as pl
from jax.experimental.pallas import tpu as pltpu


K = 5            # conv kernel size (both convs), stride 1, padding 1
_NEG = -1e30     # finite stand-in for MaxPool's -inf padding (activations are
                 # O(10), so this never wins a max and 0 * _NEG stays 0)


# ------------------------------ geometry ------------------------------------

class _Geom(NamedTuple):
    win1: int; l1: int; ch1: int; cw1: int; ph1: int; pw1: int
    le1: int; lxe1: int; lm1: int
    win2: int; ch2: int; cw2: int; ph2: int; pw2: int
    le2: int; lv2: int; lm2: int


def _geom(h: int, w: int) -> _Geom:
    win1 = w + 2                              # conv1 padded-input flat width
    l1 = (h + 2) * win1
    ch1, cw1 = h + 2 - K + 1, w + 2 - K + 1   # conv1 output H, W
    ph1, pw1 = ch1 // 2 + 1, cw1 // 2 + 1     # pool1 output H, W
    le1 = 2 * ph1 * win1                      # embedded conv1-output domain
    lxe1 = (K - 1) * win1 + (K - 1) + le1     # shifted padded-input length
    lm1 = le1 - win1 - 1                      # pooled-max slab length
    win2 = pw1 + 2                            # conv2 padded-input flat width
    ch2, cw2 = ph1 + 2 - K + 1, pw1 + 2 - K + 1
    ph2, pw2 = ch2 // 2 + 1, cw2 // 2 + 1     # final output H, W
    le2 = 2 * ph2 * win2
    lv2 = (K - 1) * win2 + (K - 1) + le2      # conv2 shifted-input length
    lm2 = le2 - win2 - 1
    assert ch1 >= 1 and cw1 >= 1 and ch2 >= 1 and cw2 >= 1, "input too small"
    assert lxe1 >= l1 + win1 + 1
    # Every MaxPool2d(2,2,padding=1) window contains at least one real pixel
    # (kernel==stride==2, pad==1), which the sentinel / zero masking relies on.
    return _Geom(win1, l1, ch1, cw1, ph1, pw1, le1, lxe1, lm1,
                 win2, ch2, cw2, ph2, pw2, le2, lv2, lm2)


def _round_up(n, m):
    return -(-n // m) * m


# ------------------------------ fused kernel --------------------------------

def _fused_forward_kernel(xp_ref, w1_ref, b1_ref, w2_ref, b2_ref,
                          mask1_ref, mask2_ref, sel1_ref, sel2_ref,
                          o_ref, xs1_ref, xs2_ref,
                          *, k, win1, le1, win2, le2):
    """conv1 -> maxpool -> conv2+relu -> maxpool, all on VMEM-resident data.

    xp_ref   : (CinP, Lxe1)    zero-padded input, flat spatial, shifted by
                               win1+1 so every tap slice start is >= 0
    w1_ref   : (C1P, k*k*CinP) conv1 weights, taps folded into contraction
    b1_ref   : (C1P, 1)
    w2_ref   : (C2P, k*k*C1P)  conv2 weights, taps folded into contraction
    b2_ref   : (C2P, 1)
    mask1/2  : (1, Le)         1.0 at embedded positions holding real pixels
    sel1_ref : (Lm1, Lv2) bf16 single 0/1 matrix: stride-2 gather of the
                               pooled maxima + re-embed into conv2's
                               zero-padded (shifted) flat domain
    sel2_ref : (Lm2, Ph2*Pw2)  same for the final pool
    o_ref    : (C2P, Ph2*Pw2)
    xs1/xs2  : VMEM scratch for the stacked-shift conv operands
    """
    cin = xp_ref.shape[0]
    c1p = w1_ref.shape[0]

    def pool_max(v, win, le):
        # max over the 2x2 window whose bottom-right corner is embedded
        # position q = a + win + 1 -> four lane-shifted views (XLU/VPU only).
        return jnp.maximum(
            jnp.maximum(v[:, win + 1:le], v[:, win:le - 1]),
            jnp.maximum(v[:, 1:le - win], v[:, :le - win - 1]))

    # ---- conv1: stack the k*k shifted views once, then one K=k*k*Cin dot ---
    for ki in range(k):
        for kj in range(k):
            t = ki * k + kj
            off = ki * win1 + kj
            xs1_ref[t * cin:(t + 1) * cin, :] = xp_ref[:, off:off + le1]
    acc1 = jnp.dot(w1_ref[...], xs1_ref[...],
                   preferred_element_type=jnp.float32)
    v1 = acc1 + b1_ref[...]                                  # (c1p, le1)
    # Sentinel-mask junk / out-of-range embedded positions so the window max
    # reproduces PyTorch's -inf padding (pool runs on PRE-relu activations).
    v1 = jnp.where(mask1_ref[...] > 0.0, v1, _NEG)

    # ---- maxpool(2,2,pad=1): elementwise max of 4 shifted views, then one
    #      0/1 selection matmul gathers the stride-2 anchors and re-embeds
    #      them directly into conv2's zero-padded shifted flat domain. -------
    m1 = pool_max(v1, win1, le1)                             # (c1p, lm1)
    v7 = jnp.dot(m1.astype(sel1_ref.dtype), sel1_ref[...],
                 preferred_element_type=jnp.float32)         # (c1p, lv2)

    # ---- conv2 + bias + relu: same stacked-contraction scheme --------------
    for ki in range(k):
        for kj in range(k):
            t = ki * k + kj
            off = ki * win2 + kj
            xs2_ref[t * c1p:(t + 1) * c1p, :] = v7[:, off:off + le2]
    acc2 = jnp.dot(w2_ref[...], xs2_ref[...],
                   preferred_element_type=jnp.float32)
    v9 = jnp.maximum(acc2 + b2_ref[...], 0.0)                # (c2p, le2)
    # Post-ReLU everything valid is >= 0, so a multiplicative 0/1 mask is
    # exactly equivalent to -inf padding here.
    v9 = v9 * mask2_ref[...]

    # ---- final maxpool(2,2,pad=1) + gather of the Ph2*Pw2 output pixels ----
    m2 = pool_max(v9, win2, le2)                             # (c2p, lm2)
    o_ref[...] = jnp.dot(m2.astype(sel2_ref.dtype), sel2_ref[...],
                         preferred_element_type=jnp.float32)


# --------------------------- one-off packing (init) -------------------------

def _stack_conv_weights(w, cin_pad, cout_pad):
    """(Cout,Cin,K,K) -> (cout_pad, K*K*cin_pad), taps folded into contraction."""
    cout, cin, k, _ = w.shape
    wt = np.transpose(np.asarray(w, np.float32), (0, 2, 3, 1))   # (Cout,K,K,Cin)
    packed = np.zeros((cout_pad, k * k, cin_pad), np.float32)
    packed[:cout, :, :cin] = wt.reshape(cout, k * k, cin)
    return jnp.asarray(packed.reshape(cout_pad, k * k * cin_pad))


def _pad_bias(b, cout_pad):
    bp = np.zeros((cout_pad, 1), np.float32)
    bp[:len(np.asarray(b)), 0] = np.asarray(b, np.float32)
    return jnp.asarray(bp)


def prepare_params(params, height, width):
    """Pack weights / biases / masks / selection matrices ONCE (off hot path)."""
    w1, b1, w2, b2 = params
    g = _geom(height, width)
    cin = w1.shape[1]
    cinp = _round_up(cin, 8)
    c1p = _round_up(w1.shape[0], 8)      # 5  -> 8
    c2p = _round_up(w2.shape[0], 8)      # 10 -> 16

    # valid-position masks over the embedded flat domains
    mask1 = np.zeros((1, g.le1), np.float32)
    for hh in range(g.ch1):
        for ww in range(g.cw1):
            mask1[0, (hh + 1) * g.win1 + (ww + 1)] = 1.0
    mask2 = np.zeros((1, g.le2), np.float32)
    for hh in range(g.ch2):
        for ww in range(g.cw2):
            mask2[0, (hh + 1) * g.win2 + (ww + 1)] = 1.0

    # single 0/1 gather/re-embed matrices (bf16: values are exactly 0/1)
    sel1 = np.zeros((g.lm1, g.lv2), np.float32)
    for i in range(g.ph1):
        for j in range(g.pw1):
            sel1[2 * i * g.win1 + 2 * j, (i + 2) * g.win2 + (j + 2)] = 1.0
    sel2 = np.zeros((g.lm2, g.ph2 * g.pw2), np.float32)
    for i in range(g.ph2):
        for j in range(g.pw2):
            sel2[2 * i * g.win2 + 2 * j, i * g.pw2 + j] = 1.0

    return {
        "w1s": _stack_conv_weights(w1, cinp, c1p),
        "b1": _pad_bias(b1, c1p),
        "w2s": _stack_conv_weights(w2, c1p, c2p),
        "b2": _pad_bias(b2, c2p),
        "mask1": jnp.asarray(mask1),
        "mask2": jnp.asarray(mask2),
        "sel1": jnp.asarray(sel1, jnp.bfloat16),
        "sel2": jnp.asarray(sel2, jnp.bfloat16),
    }


# ------------------------------ hot-path wrapper -----------------------------

@functools.partial(jax.jit, static_argnames=("out_channels",))
def model_forward(x, packed, *, out_channels):
    """x: (N, 16, H, W) NCHW -> (N, out_channels, H', W') — the module's v10."""
    n, cin, h, w = x.shape
    g = _geom(h, w)
    cinp = packed["w1s"].shape[1] // (K * K)
    c1p = packed["w1s"].shape[0]
    c2p = packed["w2s"].shape[0]
    assert packed["mask1"].shape == (1, g.le1)
    assert packed["sel1"].shape == (g.lm1, g.lv2)

    # cheap, per-input layout plumbing: zero-pad (spatial + channel), flatten,
    # and shift by win1+1 lanes so every in-kernel tap slice start is >= 0.
    xpad = jnp.pad(x.astype(jnp.float32),
                   ((0, 0), (0, cinp - cin), (1, 1), (1, 1)))
    xp = xpad.reshape(n, cinp, g.l1)
    xp = jnp.pad(xp, ((0, 0), (0, 0),
                      (g.win1 + 1, g.lxe1 - g.l1 - g.win1 - 1)))

    kernel = functools.partial(_fused_forward_kernel, k=K,
                               win1=g.win1, le1=g.le1,
                               win2=g.win2, le2=g.le2)
    npix = g.ph2 * g.pw2
    out = pl.pallas_call(
        kernel,
        out_shape=jax.ShapeDtypeStruct((n, c2p, npix), jnp.float32),
        grid_spec=pltpu.PrefetchScalarGridSpec(
            num_scalar_prefetch=0,
            grid=(n,),
            in_specs=[
                pl.BlockSpec((None, cinp, g.lxe1), lambda b: (b, 0, 0)),
                pl.BlockSpec(packed["w1s"].shape, lambda b: (0, 0)),
                pl.BlockSpec(packed["b1"].shape, lambda b: (0, 0)),
                pl.BlockSpec(packed["w2s"].shape, lambda b: (0, 0)),
                pl.BlockSpec(packed["b2"].shape, lambda b: (0, 0)),
                pl.BlockSpec(packed["mask1"].shape, lambda b: (0, 0)),
                pl.BlockSpec(packed["mask2"].shape, lambda b: (0, 0)),
                pl.BlockSpec(packed["sel1"].shape, lambda b: (0, 0)),
                pl.BlockSpec(packed["sel2"].shape, lambda b: (0, 0)),
            ],
            out_specs=pl.BlockSpec((None, c2p, npix), lambda b: (b, 0, 0)),
            scratch_shapes=[
                pltpu.VMEM((K * K * cinp, g.le1), jnp.float32),
                pltpu.VMEM((K * K * c1p, g.le2), jnp.float32),
            ]),
        compiler_params=pltpu.CompilerParams(
            dimension_semantics=("parallel",)),
    )(xp, packed["w1s"], packed["b1"], packed["w2s"], packed["b2"],
      packed["mask1"], packed["mask2"], packed["sel1"], packed["sel2"])

    # strip channel padding, restore NCHW
    return out[:, :out_channels].reshape(n, out_channels, g.ph2, g.pw2)


# ------------------------------ pure-JAX reference ---------------------------

def model_forward_ref(x, params):
    w1, b1, w2, b2 = params
    dn = ("NCHW", "OIHW", "NCHW")

    def conv(x, w, b):
        y = lax.conv_general_dilated(x, w, (1, 1), [(1, 1), (1, 1)],
                                     dimension_numbers=dn)
        return y + b[None, :, None, None]

    def pool(x):
        return lax.reduce_window(x, -jnp.inf, lax.max,
                                 window_dimensions=(1, 1, 2, 2),
                                 window_strides=(1, 1, 2, 2),
                                 padding=((0, 0), (0, 0), (1, 1), (1, 1)))

    v1 = conv(x, w1, b1)
    v7 = pool(v1)
    v9 = jnp.maximum(conv(v7, w2, b2), 0.0)
    return pool(v9)


# ---------------------------------- main -------------------------------------

if __name__ == "__main__":
    key = jax.random.PRNGKey(0)
    k1, k2, k3, k4, k5 = jax.random.split(key, 5)

    # Conv2d(16, 5, 5, pad=1) ; Conv2d(5, 10, 5, pad=1) — synthetic init.
    w1 = jax.random.normal(k1, (5, 16, 5, 5), jnp.float32) * 0.05
    b1 = jax.random.normal(k2, (5,), jnp.float32) * 0.05
    w2 = jax.random.normal(k3, (10, 5, 5, 5), jnp.float32) * 0.05
    b2 = jax.random.normal(k4, (10,), jnp.float32) * 0.05
    params = (w1, b1, w2, b2)

    # Small NCHW input consistent with the module (Cin=16); batch=2 exercises
    # the parallel batch grid axis.
    B, H, W = 2, 16, 16
    x = jax.random.normal(k5, (B, 16, H, W), jnp.float32)

    packed = prepare_params(params, H, W)          # one-off, off the hot path
    out = jax.block_until_ready(model_forward(x, packed, out_channels=10))
    ref = jax.block_until_ready(model_forward_ref(x, params))

    assert out.shape == ref.shape == (B, 10, 4, 4), (out.shape, ref.shape)
    # Conv dots and the 0/1 selection matmuls run on the MXU at default f32
    # precision (operands rounded to bf16); the pooling max itself is exact on
    # the VPU. Tolerance covers one bf16 rounding of O(1) activations plus its
    # propagation through conv2.
    assert jnp.allclose(out, ref, atol=2e-2, rtol=2e-2), \
        float(jnp.max(jnp.abs(out - ref)))

    print("KERNEL_OK")
</pallas_src>

<mosaic_0001>
module attributes {stable_mosaic.version = 11 : i64} {
  func.func @_fused_forward_kernel(%arg0: i32, %arg1: memref<1x16x364xf32, #tpu.memory_space<vmem>>, %arg2: memref<8x400xf32, #tpu.memory_space<vmem>>, %arg3: memref<8x1xf32, #tpu.memory_space<vmem>>, %arg4: memref<16x200xf32, #tpu.memory_space<vmem>>, %arg5: memref<16x1xf32, #tpu.memory_space<vmem>>, %arg6: memref<1x288xf32, #tpu.memory_space<vmem>>, %arg7: memref<1x80xf32, #tpu.memory_space<vmem>>, %arg8: memref<269x124xbf16, #tpu.memory_space<vmem>>, %arg9: memref<69x16xbf16, #tpu.memory_space<vmem>>, %arg10: memref<1x16x16xf32, #tpu.memory_space<vmem>>, %arg11: memref<400x288xf32, #tpu.memory_space<vmem>>, %arg12: memref<200x80xf32, #tpu.memory_space<vmem>>) attributes {dimension_semantics = [#tpu.dimension_semantics<parallel>], iteration_bounds = array<i64: 2>, scalar_prefetch = 0 : i64, scratch_operands = 2 : i64, tpu.core_type = #tpu.core_type<tc>, window_params = [{transform_indices = @transform_0, window_bounds = array<i64: 1, 16, 364>}, {pipeline_mode = #tpu.pipeline_mode<synchronous>, transform_indices = @transform_1, window_bounds = array<i64: 8, 400>}, {pipeline_mode = #tpu.pipeline_mode<synchronous>, transform_indices = @transform_2, window_bounds = array<i64: 8, 1>}, {pipeline_mode = #tpu.pipeline_mode<synchronous>, transform_indices = @transform_3, window_bounds = array<i64: 16, 200>}, {pipeline_mode = #tpu.pipeline_mode<synchronous>, transform_indices = @transform_4, window_bounds = array<i64: 16, 1>}, {pipeline_mode = #tpu.pipeline_mode<synchronous>, transform_indices = @transform_5, window_bounds = array<i64: 1, 288>}, {pipeline_mode = #tpu.pipeline_mode<synchronous>, transform_indices = @transform_6, window_bounds = array<i64: 1, 80>}, {pipeline_mode = #tpu.pipeline_mode<synchronous>, transform_indices = @transform_7, window_bounds = array<i64: 269, 124>}, {pipeline_mode = #tpu.pipeline_mode<synchronous>, transform_indices = @transform_8, window_bounds = array<i64: 69, 16>}, {transform_indices = @transform_9, window_bounds = array<i64: 1, 16, 16>}]} {
    %c0 = arith.constant 0 : index
    %c0_0 = arith.constant 0 : index
    %c0_1 = arith.constant 0 : index
    %0 = vector.load %arg1[%c0, %c0_0, %c0_1] : memref<1x16x364xf32, #tpu.memory_space<vmem>>, vector<1x16x288xf32>
    %1 = vector.shape_cast %0 : vector<1x16x288xf32> to vector<16x288xf32>
    %c0_2 = arith.constant 0 : index
    %c0_3 = arith.constant 0 : index
    %2 = vector.load %arg11[%c0_2, %c0_3] : memref<400x288xf32, #tpu.memory_space<vmem>>, vector<16x288xf32>
    tpu.vector_store %arg11[%c0_2, %c0_3], %1 {strides = array<i32>} : memref<400x288xf32, #tpu.memory_space<vmem>>, vector<16x288xf32>,
    %c0_4 = arith.constant 0 : index
    %c0_5 = arith.constant 0 : index
    %c1 = arith.constant 1 : index
    %3 = vector.load %arg1[%c0_4, %c0_5, %c1] : memref<1x16x364xf32, #tpu.memory_space<vmem>>, vector<1x16x288xf32>
    %4 = vector.shape_cast %3 : vector<1x16x288xf32> to vector<16x288xf32>
    %c16 = arith.constant 16 : index
    %c0_6 = arith.constant 0 : index
    %5 = vector.load %arg11[%c16, %c0_6] : memref<400x288xf32, #tpu.memory_space<vmem>>, vector<16x288xf32>
    tpu.vector_store %arg11[%c16, %c0_6], %4 {strides = array<i32>} : memref<400x288xf32, #tpu.memory_space<vmem>>, vector<16x288xf32>,
    %c0_7 = arith.constant 0 : index
    %c0_8 = arith.constant 0 : index
    %c2 = arith.constant 2 : index
    %6 = vector.load %arg1[%c0_7, %c0_8, %c2] : memref<1x16x364xf32, #tpu.memory_space<vmem>>, vector<1x16x288xf32>
    %7 = vector.shape_cast %6 : vector<1x16x288xf32> to vector<16x288xf32>
    %c32 = arith.constant 32 : index
    %c0_9 = arith.constant 0 : index
    %8 = vector.load %arg11[%c32, %c0_9] : memref<400x288xf32, #tpu.memory_space<vmem>>, vector<16x288xf32>
    tpu.vector_store %arg11[%c32, %c0_9], %7 {strides = array<i32>} : memref<400x288xf32, #tpu.memory_space<vmem>>, vector<16x288xf32>,
    %c0_10 = arith.constant 0 : index
    %c0_11 = arith.constant 0 : index
    %c3 = arith.constant 3 : index
    %9 = vector.load %arg1[%c0_10, %c0_11, %c3] : memref<1x16x364xf32, #tpu.memory_space<vmem>>, vector<1x16x288xf32>
    %10 = vector.shape_cast %9 : vector<1x16x288xf32> to vector<16x288xf32>
    %c48 = arith.constant 48 : index
    %c0_12 = arith.constant 0 : index
    %11 = vector.load %arg11[%c48, %c0_12] : memref<400x288xf32, #tpu.memory_space<vmem>>, vector<16x288xf32>
    tpu.vector_store %arg11[%c48, %c0_12], %10 {strides = array<i32>} : memref<400x288xf32, #tpu.memory_space<vmem>>, vector<16x288xf32>,
    %c0_13 = arith.constant 0 : index
    %c0_14 = arith.constant 0 : index
    %c4 = arith.constant 4 : index
    %12 = vector.load %arg1[%c0_13, %c0_14, %c4] : memref<1x16x364xf32, #tpu.memory_space<vmem>>, vector<1x16x288xf32>
    %13 = vector.shape_cast %12 : vector<1x16x288xf32> to vector<16x288xf32>
    %c64 = arith.constant 64 : index
    %c0_15 = arith.constant 0 : index
    %14 = vector.load %arg11[%c64, %c0_15] : memref<400x288xf32, #tpu.memory_space<vmem>>, vector<16x288xf32>
    tpu.vector_store %arg11[%c64, %c0_15], %13 {strides = array<i32>} : memref<400x288xf32, #tpu.memory_space<vmem>>, vector<16x288xf32>,
    %c0_16 = arith.constant 0 : index
    %c0_17 = arith.constant 0 : index
    %c18 = arith.constant 18 : index
    %15 = vector.load %arg1[%c0_16, %c0_17, %c18] : memref<1x16x364xf32, #tpu.memory_space<vmem>>, vector<1x16x288xf32>
    %16 = vector.shape_cast %15 : vector<1x16x288xf32> to vector<16x288xf32>
    %c80 = arith.constant 80 : index
    %c0_18 = arith.constant 0 : index
    %17 = vector.load %arg11[%c80, %c0_18] : memref<400x288xf32, #tpu.memory_space<vmem>>, vector<16x288xf32>
    tpu.vector_store %arg11[%c80, %c0_18], %16 {strides = array<i32>} : memref<400x288xf32, #tpu.memory_space<vmem>>, vector<16x288xf32>,
    %c0_19 = arith.constant 0 : index
    %c0_20 = arith.constant 0 : index
    %c19 = arith.constant 19 : index
    %18 = vector.load %arg1[%c0_19, %c0_20, %c19] : memref<1x16x364xf32, #tpu.memory_space<vmem>>, vector<1x16x288xf32>
    %19 = vector.shape_cast %18 : vector<1x16x288xf32> to vector<16x288xf32>
    %c96 = arith.constant 96 : index
    %c0_21 = arith.constant 0 : index
    %20 = vector.load %arg11[%c96, %c0_21] : memref<400x288xf32, #tpu.memory_space<vmem>>, vector<16x288xf32>
    tpu.vector_store %arg11[%c96, %c0_21], %19 {strides = array<i32>} : memref<400x288xf32, #tpu.memory_space<vmem>>, vector<16x288xf32>,
    %c0_22 = arith.constant 0 : index
    %c0_23 = arith.constant 0 : index
    %c20 = arith.constant 20 : index
    %21 = vector.load %arg1[%c0_22, %c0_23, %c20] : memref<1x16x364xf32, #tpu.memory_space<vmem>>, vector<1x16x288xf32>
    %22 = vector.shape_cast %21 : vector<1x16x288xf32> to vector<16x288xf32>
    %c112 = arith.constant 112 : index
    %c0_24 = arith.constant 0 : index
    %23 = vector.load %arg11[%c112, %c0_24] : memref<400x288xf32, #tpu.memory_space<vmem>>, vector<16x288xf32>
    tpu.vector_store %arg11[%c112, %c0_24], %22 {strides = array<i32>} : memref<400x288xf32, #tpu.memory_space<vmem>>, vector<16x288xf32>,
    %c0_25 = arith.constant 0 : index
    %c0_26 = arith.constant 0 : index
    %c21 = arith.constant 21 : index
    %24 = vector.load %arg1[%c0_25, %c0_26, %c21] : memref<1x16x364xf32, #tpu.memory_space<vmem>>, vector<1x16x288xf32>
    %25 = vector.shape_cast %24 : vector<1x16x288xf32> to vector<16x288xf32>
    %c128 = arith.constant 128 : index
    %c0_27 = arith.constant 0 : index
    %26 = vector.load %arg11[%c128, %c0_27] : memref<400x288xf32, #tpu.memory_space<vmem>>, vector<16x288xf32>
    tpu.vector_store %arg11[%c128, %c0_27], %25 {strides = array<i32>} : memref<400x288xf32, #tpu.memory_space<vmem>>, vector<16x288xf32>,
    %c0_28 = arith.constant 0 : index
    %c0_29 = arith.constant 0 : index
    %c22 = arith.constant 22 : index
    %27 = vector.load %arg1[%c0_28, %c0_29, %c22] : memref<1x16x364xf32, #tpu.memory_space<vmem>>, vector<1x16x288xf32>
    %28 = vector.shape_cast %27 : vector<1x16x288xf32> to vector<16x288xf32>
    %c144 = arith.constant 144 : index
    %c0_30 = arith.constant 0 : index
    %29 = vector.load %arg11[%c144, %c0_30] : memref<400x288xf32, #tpu.memory_space<vmem>>, vector<16x288xf32>
    tpu.vector_store %arg11[%c144, %c0_30], %28 {strides = array<i32>} : memref<400x288xf32, #tpu.memory_space<vmem>>, vector<16x288xf32>,
    %c0_31 = arith.constant 0 : index
    %c0_32 = arith.constant 0 : index
    %c36 = arith.constant 36 : index
    %30 = vector.load %arg1[%c0_31, %c0_32, %c36] : memref<1x16x364xf32, #tpu.memory_space<vmem>>, vector<1x16x288xf32>
    %31 = vector.shape_cast %30 : vector<1x16x288xf32> to vector<16x288xf32>
    %c160 = arith.constant 160 : index
    %c0_33 = arith.constant 0 : index
    %32 = vector.load %arg11[%c160, %c0_33] : memref<400x288xf32, #tpu.memory_space<vmem>>, vector<16x288xf32>
    tpu.vector_store %arg11[%c160, %c0_33], %31 {strides = array<i32>} : memref<400x288xf32, #tpu.memory_space<vmem>>, vector<16x288xf32>,
    %c0_34 = arith.constant 0 : index
    %c0_35 = arith.constant 0 : index
    %c37 = arith.constant 37 : index
    %33 = vector.load %arg1[%c0_34, %c0_35, %c37] : memref<1x16x364xf32, #tpu.memory_space<vmem>>, vector<1x16x288xf32>
    %34 = vector.shape_cast %33 : vector<1x16x288xf32> to vector<16x288xf32>
    %c176 = arith.constant 176 : index
    %c0_36 = arith.constant 0 : index
    %35 = vector.load %arg11[%c176, %c0_36] : memref<400x288xf32, #tpu.memory_space<vmem>>, vector<16x288xf32>
    tpu.vector_store %arg11[%c176, %c0_36], %34 {strides = array<i32>} : memref<400x288xf32, #tpu.memory_space<vmem>>, vector<16x288xf32>,
    %c0_37 = arith.constant 0 : index
    %c0_38 = arith.constant 0 : index
    %c38 = arith.constant 38 : index
    %36 = vector.load %arg1[%c0_37, %c0_38, %c38] : memref<1x16x364xf32, #tpu.memory_space<vmem>>, vector<1x16x288xf32>
    %37 = vector.shape_cast %36 : vector<1x16x288xf32> to vector<16x288xf32>
    %c192 = arith.constant 192 : index
    %c0_39 = arith.constant 0 : index
    %38 = vector.load %arg11[%c192, %c0_39] : memref<400x288xf32, #tpu.memory_space<vmem>>, vector<16x288xf32>
    tpu.vector_store %arg11[%c192, %c0_39], %37 {strides = array<i32>} : memref<400x288xf32, #tpu.memory_space<vmem>>, vector<16x288xf32>,
    %c0_40 = arith.constant 0 : index
    %c0_41 = arith.constant 0 : index
    %c39 = arith.constant 39 : index
    %39 = vector.load %arg1[%c0_40, %c0_41, %c39] : memref<1x16x364xf32, #tpu.memory_space<vmem>>, vector<1x16x288xf32>
    %40 = vector.shape_cast %39 : vector<1x16x288xf32> to vector<16x288xf32>
    %c208 = arith.constant 208 : index
    %c0_42 = arith.constant 0 : index
    %41 = vector.load %arg11[%c208, %c0_42] : memref<400x288xf32, #tpu.memory_space<vmem>>, vector<16x288xf32>
    tpu.vector_store %arg11[%c208, %c0_42], %40 {strides = array<i32>} : memref<400x288xf32, #tpu.memory_space<vmem>>, vector<16x288xf32>,
    %c0_43 = arith.constant 0 : index
    %c0_44 = arith.constant 0 : index
    %c40 = arith.constant 40 : index
    %42 = vector.load %arg1[%c0_43, %c0_44, %c40] : memref<1x16x364xf32, #tpu.memory_space<vmem>>, vector<1x16x288xf32>
    %43 = vector.shape_cast %42 : vector<1x16x288xf32> to vector<16x288xf32>
    %c224 = arith.constant 224 : index
    %c0_45 = arith.constant 0 : index
    %44 = vector.load %arg11[%c224, %c0_45] : memref<400x288xf32, #tpu.memory_space<vmem>>, vector<16x288xf32>
    tpu.vector_store %arg11[%c224, %c0_45], %43 {strides = array<i32>} : memref<400x288xf32, #tpu.memory_space<vmem>>, vector<16x288xf32>,
    %c0_46 = arith.constant 0 : index
    %c0_47 = arith.constant 0 : index
    %c54 = arith.constant 54 : index
    %45 = vector.load %arg1[%c0_46, %c0_47, %c54] : memref<1x16x364xf32, #tpu.memory_space<vmem>>, vector<1x16x288xf32>
    %46 = vector.shape_cast %45 : vector<1x16x288xf32> to vector<16x288xf32>
    %c240 = arith.constant 240 : index
    %c0_48 = arith.constant 0 : index
    %47 = vector.load %arg11[%c240, %c0_48] : memref<400x288xf32, #tpu.memory_space<vmem>>, vector<16x288xf32>
    tpu.vector_store %arg11[%c240, %c0_48], %46 {strides = array<i32>} : memref<400x288xf32, #tpu.memory_space<vmem>>, vector<16x288xf32>,
    %c0_49 = arith.constant 0 : index
    %c0_50 = arith.constant 0 : index
    %c55 = arith.constant 55 : index
    %48 = vector.load %arg1[%c0_49, %c0_50, %c55] : memref<1x16x364xf32, #tpu.memory_space<vmem>>, vector<1x16x288xf32>
    %49 = vector.shape_cast %48 : vector<1x16x288xf32> to vector<16x288xf32>
    %c256 = arith.constant 256 : index
    %c0_51 = arith.constant 0 : index
    %50 = vector.load %arg11[%c256, %c0_51] : memref<400x288xf32, #tpu.memory_space<vmem>>, vector<16x288xf32>
    tpu.vector_store %arg11[%c256, %c0_51], %49 {strides = array<i32>} : memref<400x288xf32, #tpu.memory_space<vmem>>, vector<16x288xf32>,
    %c0_52 = arith.constant 0 : index
    %c0_53 = arith.constant 0 : index
    %c56 = arith.constant 56 : index
    %51 = vector.load %arg1[%c0_52, %c0_53, %c56] : memref<1x16x364xf32, #tpu.memory_space<vmem>>, vector<1x16x288xf32>
    %52 = vector.shape_cast %51 : vector<1x16x288xf32> to vector<16x288xf32>
    %c272 = arith.constant 272 : index
    %c0_54 = arith.constant 0 : index
    %53 = vector.load %arg11[%c272, %c0_54] : memref<400x288xf32, #tpu.memory_space<vmem>>, vector<16x288xf32>
    tpu.vector_store %arg11[%c272, %c0_54], %52 {strides = array<i32>} : memref<400x288xf32, #tpu.memory_space<vmem>>, vector<16x288xf32>,
    %c0_55 = arith.constant 0 : index
    %c0_56 = arith.constant 0 : index
    %c57 = arith.constant 57 : index
    %54 = vector.load %arg1[%c0_55, %c0_56, %c57] : memref<1x16x364xf32, #tpu.memory_space<vmem>>, vector<1x16x288xf32>
    %55 = vector.shape_cast %54 : vector<1x16x288xf32> to vector<16x288xf32>
    %c288 = arith.constant 288 : index
    %c0_57 = arith.constant 0 : index
    %56 = vector.load %arg11[%c288, %c0_57] : memref<400x288xf32, #tpu.memory_space<vmem>>, vector<16x288xf32>
    tpu.vector_store %arg11[%c288, %c0_57], %55 {strides = array<i32>} : memref<400x288xf32, #tpu.memory_space<vmem>>, vector<16x288xf32>,
    %c0_58 = arith.constant 0 : index
    %c0_59 = arith.constant 0 : index
    %c58 = arith.constant 58 : index
    %57 = vector.load %arg1[%c0_58, %c0_59, %c58] : memref<1x16x364xf32, #tpu.memory_space<vmem>>, vector<1x16x288xf32>
    %58 = vector.shape_cast %57 : vector<1x16x288xf32> to vector<16x288xf32>
    %c304 = arith.constant 304 : index
    %c0_60 = arith.constant 0 : index
    %59 = vector.load %arg11[%c304, %c0_60] : memref<400x288xf32, #tpu.memory_space<vmem>>, vector<16x288xf32>
    tpu.vector_store %arg11[%c304, %c0_60], %58 {strides = array<i32>} : memref<400x288xf32, #tpu.memory_space<vmem>>, vector<16x288xf32>,
    %c0_61 = arith.constant 0 : index
    %c0_62 = arith.constant 0 : index
    %c72 = arith.constant 72 : index
    %60 = vector.load %arg1[%c0_61, %c0_62, %c72] : memref<1x16x364xf32, #tpu.memory_space<vmem>>, vector<1x16x288xf32>
    %61 = vector.shape_cast %60 : vector<1x16x288xf32> to vector<16x288xf32>
    %c320 = arith.constant 320 : index
    %c0_63 = arith.constant 0 : index
    %62 = vector.load %arg11[%c320, %c0_63] : memref<400x288xf32, #tpu.memory_space<vmem>>, vector<16x288xf32>
    tpu.vector_store %arg11[%c320, %c0_63], %61 {strides = array<i32>} : memref<400x288xf32, #tpu.memory_space<vmem>>, vector<16x288xf32>,
    %c0_64 = arith.constant 0 : index
    %c0_65 = arith.constant 0 : index
    %c73 = arith.constant 73 : index
    %63 = vector.load %arg1[%c0_64, %c0_65, %c73] : memref<1x16x364xf32, #tpu.memory_space<vmem>>, vector<1x16x288xf32>
    %64 = vector.shape_cast %63 : vector<1x16x288xf32> to vector<16x288xf32>
    %c336 = arith.constant 336 : index
    %c0_66 = arith.constant 0 : index
    %65 = vector.load %arg11[%c336, %c0_66] : memref<400x288xf32, #tpu.memory_space<vmem>>, vector<16x288xf32>
    tpu.vector_store %arg11[%c336, %c0_66], %64 {strides = array<i32>} : memref<400x288xf32, #tpu.memory_space<vmem>>, vector<16x288xf32>,
    %c0_67 = arith.constant 0 : index
    %c0_68 = arith.constant 0 : index
    %c74 = arith.constant 74 : index
    %66 = vector.load %arg1[%c0_67, %c0_68, %c74] : memref<1x16x364xf32, #tpu.memory_space<vmem>>, vector<1x16x288xf32>
    %67 = vector.shape_cast %66 : vector<1x16x288xf32> to vector<16x288xf32>
    %c352 = arith.constant 352 : index
    %c0_69 = arith.constant 0 : index
    %68 = vector.load %arg11[%c352, %c0_69] : memref<400x288xf32, #tpu.memory_space<vmem>>, vector<16x288xf32>
    tpu.vector_store %arg11[%c352, %c0_69], %67 {strides = array<i32>} : memref<400x288xf32, #tpu.memory_space<vmem>>, vector<16x288xf32>,
    %c0_70 = arith.constant 0 : index
    %c0_71 = arith.constant 0 : index
    %c75 = arith.constant 75 : index
    %69 = vector.load %arg1[%c0_70, %c0_71, %c75] : memref<1x16x364xf32, #tpu.memory_space<vmem>>, vector<1x16x288xf32>
    %70 = vector.shape_cast %69 : vector<1x16x288xf32> to vector<16x288xf32>
    %c368 = arith.constant 368 : index
    %c0_72 = arith.constant 0 : index
    %71 = vector.load %arg11[%c368, %c0_72] : memref<400x288xf32, #tpu.memory_space<vmem>>, vector<16x288xf32>
    tpu.vector_store %arg11[%c368, %c0_72], %70 {strides = array<i32>} : memref<400x288xf32, #tpu.memory_space<vmem>>, vector<16x288xf32>,
    %c0_73 = arith.constant 0 : index
    %c0_74 = arith.constant 0 : index
    %c76 = arith.constant 76 : index
    %72 = vector.load %arg1[%c0_73, %c0_74, %c76] : memref<1x16x364xf32, #tpu.memory_space<vmem>>, vector<1x16x288xf32>
    %73 = vector.shape_cast %72 : vector<1x16x288xf32> to vector<16x288xf32>
    %c384 = arith.constant 384 : index
    %c0_75 = arith.constant 0 : index
    %74 = vector.load %arg11[%c384, %c0_75] : memref<400x288xf32, #tpu.memory_space<vmem>>, vector<16x288xf32>
    tpu.vector_store %arg11[%c384, %c0_75], %73 {strides = array<i32>} : memref<400x288xf32, #tpu.memory_space<vmem>>, vector<16x288xf32>,
    %c0_76 = arith.constant 0 : index
    %c0_77 = arith.constant 0 : index
    %75 = vector.load %arg2[%c0_76, %c0_77] : memref<8x400xf32, #tpu.memory_space<vmem>>, vector<8x400xf32>
    %c0_78 = arith.constant 0 : index
    %c0_79 = arith.constant 0 : index
    %76 = vector.load %arg11[%c0_78, %c0_79] : memref<400x288xf32, #tpu.memory_space<vmem>>, vector<400x288xf32>
    %cst = arith.constant dense<0.000000e+00> : vector<8x288xf32>
    %77 = tpu.matmul %75, %76, %cst {dimension_numbers = #tpu.dot_dimension_numbers<[1], [0], [0], [1], [0, 0, 1, 1], [], []>} : vector<8x400xf32>, vector<400x288xf32>, vector<8x288xf32> -> vector<8x288xf32>
    %c0_80 = arith.constant 0 : index
    %c0_81 = arith.constant 0 : index
    %78 = vector.load %arg3[%c0_80, %c0_81] : memref<8x1xf32, #tpu.memory_space<vmem>>, vector<8x1xf32>
    %79 = vector.broadcast %78 : vector<8x1xf32> to vector<8x288xf32>
    %80 = arith.addf %77, %79 : vector<8x288xf32>
    %c0_82 = arith.constant 0 : index
    %c0_83 = arith.constant 0 : index
    %81 = vector.load %arg6[%c0_82, %c0_83] : memref<1x288xf32, #tpu.memory_space<vmem>>, vector<1x288xf32>
    %cst_84 = arith.constant 0.000000e+00 : f32
    %82 = vector.broadcast %cst_84 : f32 to vector<1x288xf32>
    %83 = arith.cmpf ogt, %81, %82 : vector<1x288xf32>
    %cst_85 = arith.constant -1.000000e+30 : f32
    %84 = vector.shape_cast %83 : vector<1x288xi1> to vector<1x288xi1>
    %85 = vector.broadcast %84 : vector<1x288xi1> to vector<8x288xi1>
    %86 = vector.broadcast %cst_85 : f32 to vector<8x288xf32>
    %87 = arith.select %85, %80, %86 : vector<8x288xi1>, vector<8x288xf32>
    %88 = vector.extract_strided_slice %87 {offsets = [0, 19], sizes = [8, 269], strides = [1, 1]} : vector<8x288xf32> to vector<8x269xf32>
    %89 = vector.extract_strided_slice %87 {offsets = [0, 18], sizes = [8, 269], strides = [1, 1]} : vector<8x288xf32> to vector<8x269xf32>
    %90 = arith.maximumf %88, %89 : vector<8x269xf32>
    %91 = vector.extract_strided_slice %87 {offsets = [0, 1], sizes = [8, 269], strides = [1, 1]} : vector<8x288xf32> to vector<8x269xf32>
    %92 = vector.extract_strided_slice %87 {offsets = [0, 0], sizes = [8, 269], strides = [1, 1]} : vector<8x288xf32> to vector<8x269xf32>
    %93 = arith.maximumf %91, %92 : vector<8x269xf32>
    %94 = arith.maximumf %90, %93 : vector<8x269xf32>
    %95 = arith.truncf %94 : vector<8x269xf32> to vector<8x269xbf16>
    %c0_86 = arith.constant 0 : index
    %c0_87 = arith.constant 0 : index
    %96 = vector.load %arg8[%c0_86, %c0_87] : memref<269x124xbf16, #tpu.memory_space<vmem>>, vector<269x124xbf16>
    %cst_88 = arith.constant dense<0.000000e+00> : vector<8x124xf32>
    %97 = tpu.matmul %95, %96, %cst_88 {dimension_numbers = #tpu.dot_dimension_numbers<[1], [0], [0], [1], [0, 0, 1, 1], [], []>} : vector<8x269xbf16>, vector<269x124xbf16>, vector<8x124xf32> -> vector<8x124xf32>
    %98 = vector.extract_strided_slice %97 {offsets = [0, 0], sizes = [8, 80], strides = [1, 1]} : vector<8x124xf32> to vector<8x80xf32>
    %c0_89 = arith.constant 0 : index
    %c0_90 = arith.constant 0 : index
    %99 = vector.load %arg12[%c0_89, %c0_90] : memref<200x80xf32, #tpu.memory_space<vmem>>, vector<8x80xf32>
    tpu.vector_store %arg12[%c0_89, %c0_90], %98 {strides = array<i32>} : memref<200x80xf32, #tpu.memory_space<vmem>>, vector<8x80xf32>,
    %100 = vector.extract_strided_slice %97 {offsets = [0, 1], sizes = [8, 80], strides = [1, 1]} : vector<8x124xf32> to vector<8x80xf32>
    %c8 = arith.constant 8 : index
    %c0_91 = arith.constant 0 : index
    %101 = vector.load %arg12[%c8, %c0_91] : memref<200x80xf32, #tpu.memory_space<vmem>>, vector<8x80xf32>
    tpu.vector_store %arg12[%c8, %c0_91], %100 {strides = array<i32>} : memref<200x80xf32, #tpu.memory_space<vmem>>, vector<8x80xf32>,
    %102 = vector.extract_strided_slice %97 {offsets = [0, 2], sizes = [8, 80], strides = [1, 1]} : vector<8x124xf32> to vector<8x80xf32>
    %c16_92 = arith.constant 16 : index
    %c0_93 = arith.constant 0 : index
    %103 = vector.load %arg12[%c16_92, %c0_93] : memref<200x80xf32, #tpu.memory_space<vmem>>, vector<8x80xf32>
    tpu.vector_store %arg12[%c16_92, %c0_93], %102 {strides = array<i32>} : memref<200x80xf32, #tpu.memory_space<vmem>>, vector<8x80xf32>,
    %104 = vector.extract_strided_slice %97 {offsets = [0, 3], sizes = [8, 80], strides = [1, 1]} : vector<8x124xf32> to vector<8x80xf32>
    %c24 = arith.constant 24 : index
    %c0_94 = arith.constant 0 : index
    %105 = vector.load %arg12[%c24, %c0_94] : memref<200x80xf32, #tpu.memory_space<vmem>>, vector<8x80xf32>
    tpu.vector_store %arg12[%c24, %c0_94], %104 {strides = array<i32>} : memref<200x80xf32, #tpu.memory_space<vmem>>, vector<8x80xf32>,
    %106 = vector.extract_strided_slice %97 {offsets = [0, 4], sizes = [8, 80], strides = [1, 1]} : vector<8x124xf32> to vector<8x80xf32>
    %c32_95 = arith.constant 32 : index
    %c0_96 = arith.constant 0 : index
    %107 = vector.load %arg12[%c32_95, %c0_96] : memref<200x80xf32, #tpu.memory_space<vmem>>, vector<8x80xf32>
    tpu.vector_store %arg12[%c32_95, %c0_96], %106 {strides = array<i32>} : memref<200x80xf32, #tpu.memory_space<vmem>>, vector<8x80xf32>,
    %108 = vector.extract_strided_slice %97 {offsets = [0, 10], sizes = [8, 80], strides = [1, 1]} : vector<8x124xf32> to vector<8x80xf32>
    %c40_97 = arith.constant 40 : index
    %c0_98 = arith.constant 0 : index
    %109 = vector.load %arg12[%c40_97, %c0_98] : memref<200x80xf32, #tpu.memory_space<vmem>>, vector<8x80xf32>
    tpu.vector_store %arg12[%c40_97, %c0_98], %108 {strides = array<i32>} : memref<200x80xf32, #tpu.memory_space<vmem>>, vector<8x80xf32>,
    %110 = vector.extract_strided_slice %97 {offsets = [0, 11], sizes = [8, 80], strides = [1, 1]} : vector<8x124xf32> to vector<8x80xf32>
    %c48_99 = arith.constant 48 : index
    %c0_100 = arith.constant 0 : index
    %111 = vector.load %arg12[%c48_99, %c0_100] : memref<200x80xf32, #tpu.memory_space<vmem>>, vector<8x80xf32>
    tpu.vector_store %arg12[%c48_99, %c0_100], %110 {strides = array<i32>} : memref<200x80xf32, #tpu.memory_space<vmem>>, vector<8x80xf32>,
    %112 = vector.extract_strided_slice %97 {offsets = [0, 12], sizes = [8, 80], strides = [1, 1]} : vector<8x124xf32> to vector<8x80xf32>
    %c56_101 = arith.constant 56 : index
    %c0_102 = arith.constant 0 : index
    %113 = vector.load %arg12[%c56_101, %c0_102] : memref<200x80xf32, #tpu.memory_space<vmem>>, vector<8x80xf32>
    tpu.vector_store %arg12[%c56_101, %c0_102], %112 {strides = array<i32>} : memref<200x80xf32, #tpu.memory_space<vmem>>, vector<8x80xf32>,
    %114 = vector.extract_strided_slice %97 {offsets = [0, 13], sizes = [8, 80], strides = [1, 1]} : vector<8x124xf32> to vector<8x80xf32>
    %c64_103 = arith.constant 64 : index
    %c0_104 = arith.constant 0 : index
    %115 = vector.load %arg12[%c64_103, %c0_104] : memref<200x80xf32, #tpu.memory_space<vmem>>, vector<8x80xf32>
    tpu.vector_store %arg12[%c64_103, %c0_104], %114 {strides = array<i32>} : memref<200x80xf32, #tpu.memory_space<vmem>>, vector<8x80xf32>,
    %116 = vector.extract_strided_slice %97 {offsets = [0, 14], sizes = [8, 80], strides = [1, 1]} : vector<8x124xf32> to vector<8x80xf32>
    %c72_105 = arith.constant 72 : index
    %c0_106 = arith.constant 0 : index
    %117 = vector.load %arg12[%c72_105, %c0_106] : memref<200x80xf32, #tpu.memory_space<vmem>>, vector<8x80xf32>
    tpu.vector_store %arg12[%c72_105, %c0_106], %116 {strides = array<i32>} : memref<200x80xf32, #tpu.memory_space<vmem>>, vector<8x80xf32>,
    %118 = vector.extract_strided_slice %97 {offsets = [0, 20], sizes = [8, 80], strides = [1, 1]} : vector<8x124xf32> to vector<8x80xf32>
    %c80_107 = arith.constant 80 : index
    %c0_108 = arith.constant 0 : index
    %119 = vector.load %arg12[%c80_107, %c0_108] : memref<200x80xf32, #tpu.memory_space<vmem>>, vector<8x80xf32>
    tpu.vector_store %arg12[%c80_107, %c0_108], %118 {strides = array<i32>} : memref<200x80xf32, #tpu.memory_space<vmem>>, vector<8x80xf32>,
    %120 = vector.extract_strided_slice %97 {offsets = [0, 21], sizes = [8, 80], strides = [1, 1]} : vector<8x124xf32> to vector<8x80xf32>
    %c88 = arith.constant 88 : index
    %c0_109 = arith.constant 0 : index
    %121 = vector.load %arg12[%c88, %c0_109] : memref<200x80xf32, #tpu.memory_space<vmem>>, vector<8x80xf32>
    tpu.vector_store %arg12[%c88, %c0_109], %120 {strides = array<i32>} : memref<200x80xf32, #tpu.memory_space<vmem>>, vector<8x80xf32>,
    %122 = vector.extract_strided_slice %97 {offsets = [0, 22], sizes = [8, 80], strides = [1, 1]} : vector<8x124xf32> to vector<8x80xf32>
    %c96_110 = arith.constant 96 : index
    %c0_111 = arith.constant 0 : index
    %123 = vector.load %arg12[%c96_110, %c0_111] : memref<200x80xf32, #tpu.memory_space<vmem>>, vector<8x80xf32>
    tpu.vector_store %arg12[%c96_110, %c0_111], %122 {strides = array<i32>} : memref<200x80xf32, #tpu.memory_space<vmem>>, vector<8x80xf32>,
    %124 = vector.extract_strided_slice %97 {offsets = [0, 23], sizes = [8, 80], strides = [1, 1]} : vector<8x124xf32> to vector<8x80xf32>
    %c104 = arith.constant 104 : index
    %c0_112 = arith.constant 0 : index
    %125 = vector.load %arg12[%c104, %c0_112] : memref<200x80xf32, #tpu.memory_space<vmem>>, vector<8x80xf32>
    tpu.vector_store %arg12[%c104, %c0_112], %124 {strides = array<i32>} : memref<200x80xf32, #tpu.memory_space<vmem>>, vector<8x80xf32>,
    %126 = vector.extract_strided_slice %97 {offsets = [0, 24], sizes = [8, 80], strides = [1, 1]} : vector<8x124xf32> to vector<8x80xf32>
    %c112_113 = arith.constant 112 : index
    %c0_114 = arith.constant 0 : index
    %127 = vector.load %arg12[%c112_113, %c0_114] : memref<200x80xf32, #tpu.memory_space<vmem>>, vector<8x80xf32>
    tpu.vector_store %arg12[%c112_113, %c0_114], %126 {strides = array<i32>} : memref<200x80xf32, #tpu.memory_space<vmem>>, vector<8x80xf32>,
    %128 = vector.extract_strided_slice %97 {offsets = [0, 30], sizes = [8, 80], strides = [1, 1]} : vector<8x124xf32> to vector<8x80xf32>
    %c120 = arith.constant 120 : index
    %c0_115 = arith.constant 0 : index
    %129 = vector.load %arg12[%c120, %c0_115] : memref<200x80xf32, #tpu.memory_space<vmem>>, vector<8x80xf32>
    tpu.vector_store %arg12[%c120, %c0_115], %128 {strides = array<i32>} : memref<200x80xf32, #tpu.memory_space<vmem>>, vector<8x80xf32>,
    %130 = vector.extract_strided_slice %97 {offsets = [0, 31], sizes = [8, 80], strides = [1, 1]} : vector<8x124xf32> to vector<8x80xf32>
    %c128_116 = arith.constant 128 : index
    %c0_117 = arith.constant 0 : index
    %131 = vector.load %arg12[%c128_116, %c0_117] : memref<200x80xf32, #tpu.memory_space<vmem>>, vector<8x80xf32>
    tpu.vector_store %arg12[%c128_116, %c0_117], %130 {strides = array<i32>} : memref<200x80xf32, #tpu.memory_space<vmem>>, vector<8x80xf32>,
    %132 = vector.extract_strided_slice %97 {offsets = [0, 32], sizes = [8, 80], strides = [1, 1]} : vector<8x124xf32> to vector<8x80xf32>
    %c136 = arith.constant 136 : index
    %c0_118 = arith.constant 0 : index
    %133 = vector.load %arg12[%c136, %c0_118] : memref<200x80xf32, #tpu.memory_space<vmem>>, vector<8x80xf32>
    tpu.vector_store %arg12[%c136, %c0_118], %132 {strides = array<i32>} : memref<200x80xf32, #tpu.memory_space<vmem>>, vector<8x80xf32>,
    %134 = vector.extract_strided_slice %97 {offsets = [0, 33], sizes = [8, 80], strides = [1, 1]} : vector<8x124xf32> to vector<8x80xf32>
    %c144_119 = arith.constant 144 : index
    %c0_120 = arith.constant 0 : index
    %135 = vector.load %arg12[%c144_119, %c0_120] : memref<200x80xf32, #tpu.memory_space<vmem>>, vector<8x80xf32>
    tpu.vector_store %arg12[%c144_119, %c0_120], %134 {strides = array<i32>} : memref<200x80xf32, #tpu.memory_space<vmem>>, vector<8x80xf32>,
    %136 = vector.extract_strided_slice %97 {offsets = [0, 34], sizes = [8, 80], strides = [1, 1]} : vector<8x124xf32> to vector<8x80xf32>
    %c152 = arith.constant 152 : index
    %c0_121 = arith.constant 0 : index
    %137 = vector.load %arg12[%c152, %c0_121] : memref<200x80xf32, #tpu.memory_space<vmem>>, vector<8x80xf32>
    tpu.vector_store %arg12[%c152, %c0_121], %136 {strides = array<i32>} : memref<200x80xf32, #tpu.memory_space<vmem>>, vector<8x80xf32>,
    %138 = vector.extract_strided_slice %97 {offsets = [0, 40], sizes = [8, 80], strides = [1, 1]} : vector<8x124xf32> to vector<8x80xf32>
    %c160_122 = arith.constant 160 : index
    %c0_123 = arith.constant 0 : index
    %139 = vector.load %arg12[%c160_122, %c0_123] : memref<200x80xf32, #tpu.memory_space<vmem>>, vector<8x80xf32>
    tpu.vector_store %arg12[%c160_122, %c0_123], %138 {strides = array<i32>} : memref<200x80xf32, #tpu.memory_space<vmem>>, vector<8x80xf32>,
    %140 = vector.extract_strided_slice %97 {offsets = [0, 41], sizes = [8, 80], strides = [1, 1]} : vector<8x124xf32> to vector<8x80xf32>
    %c168 = arith.constant 168 : index
    %c0_124 = arith.constant 0 : index
    %141 = vector.load %arg12[%c168, %c0_124] : memref<200x80xf32, #tpu.memory_space<vmem>>, vector<8x80xf32>
    tpu.vector_store %arg12[%c168, %c0_124], %140 {strides = array<i32>} : memref<200x80xf32, #tpu.memory_space<vmem>>, vector<8x80xf32>,
    %142 = vector.extract_strided_slice %97 {offsets = [0, 42], sizes = [8, 80], strides = [1, 1]} : vector<8x124xf32> to vector<8x80xf32>
    %c176_125 = arith.constant 176 : index
    %c0_126 = arith.constant 0 : index
    %143 = vector.load %arg12[%c176_125, %c0_126] : memref<200x80xf32, #tpu.memory_space<vmem>>, vector<8x80xf32>
    tpu.vector_store %arg12[%c176_125, %c0_126], %142 {strides = array<i32>} : memref<200x80xf32, #tpu.memory_space<vmem>>, vector<8x80xf32>,
    %144 = vector.extract_strided_slice %97 {offsets = [0, 43], sizes = [8, 80], strides = [1, 1]} : vector<8x124xf32> to vector<8x80xf32>
    %c184 = arith.constant 184 : index
    %c0_127 = arith.constant 0 : index
    %145 = vector.load %arg12[%c184, %c0_127] : memref<200x80xf32, #tpu.memory_space<vmem>>, vector<8x80xf32>
    tpu.vector_store %arg12[%c184, %c0_127], %144 {strides = array<i32>} : memref<200x80xf32, #tpu.memory_space<vmem>>, vector<8x80xf32>,
    %146 = vector.extract_strided_slice %97 {offsets = [0, 44], sizes = [8, 80], strides = [1, 1]} : vector<8x124xf32> to vector<8x80xf32>
    %c192_128 = arith.constant 192 : index
    %c0_129 = arith.constant 0 : index
    %147 = vector.load %arg12[%c192_128, %c0_129] : memref<200x80xf32, #tpu.memory_space<vmem>>, vector<8x80xf32>
    tpu.vector_store %arg12[%c192_128, %c0_129], %146 {strides = array<i32>} : memref<200x80xf32, #tpu.memory_space<vmem>>, vector<8x80xf32>,
    %c0_130 = arith.constant 0 : index
    %c0_131 = arith.constant 0 : index
    %148 = vector.load %arg4[%c0_130, %c0_131] : memref<16x200xf32, #tpu.memory_space<vmem>>, vector<16x200xf32>
    %c0_132 = arith.constant 0 : index
    %c0_133 = arith.constant 0 : index
    %149 = vector.load %arg12[%c0_132, %c0_133] : memref<200x80xf32, #tpu.memory_space<vmem>>, vector<200x80xf32>
    %cst_134 = arith.constant dense<0.000000e+00> : vector<16x80xf32>
    %150 = tpu.matmul %148, %149, %cst_134 {dimension_numbers = #tpu.dot_dimension_numbers<[1], [0], [0], [1], [0, 0, 1, 1], [], []>} : vector<16x200xf32>, vector<200x80xf32>, vector<16x80xf32> -> vector<16x80xf32>
    %c0_135 = arith.constant 0 : index
    %c0_136 = arith.constant 0 : index
    %151 = vector.load %arg5[%c0_135, %c0_136] : memref<16x1xf32, #tpu.memory_space<vmem>>, vector<16x1xf32>
    %152 = vector.broadcast %151 : vector<16x1xf32> to vector<16x80xf32>
    %153 = arith.addf %150, %152 : vector<16x80xf32>
    %cst_137 = arith.constant 0.000000e+00 : f32
    %154 = vector.broadcast %cst_137 : f32 to vector<16x80xf32>
    %155 = arith.maximumf %153, %154 : vector<16x80xf32>
    %c0_138 = arith.constant 0 : index
    %c0_139 = arith.constant 0 : index
    %156 = vector.load %arg7[%c0_138, %c0_139] : memref<1x80xf32, #tpu.memory_space<vmem>>, vector<1x80xf32>
    %157 = vector.broadcast %156 : vector<1x80xf32> to vector<16x80xf32>
    %158 = arith.mulf %155, %157 : vector<16x80xf32>
    %159 = vector.extract_strided_slice %158 {offsets = [0, 11], sizes = [16, 69], strides = [1, 1]} : vector<16x80xf32> to vector<16x69xf32>
    %160 = vector.extract_strided_slice %158 {offsets = [0, 10], sizes = [16, 69], strides = [1, 1]} : vector<16x80xf32> to vector<16x69xf32>
    %161 = arith.maximumf %159, %160 : vector<16x69xf32>
    %162 = vector.extract_strided_slice %158 {offsets = [0, 1], sizes = [16, 69], strides = [1, 1]} : vector<16x80xf32> to vector<16x69xf32>
    %163 = vector.extract_strided_slice %158 {offsets = [0, 0], sizes = [16, 69], strides = [1, 1]} : vector<16x80xf32> to vector<16x69xf32>
    %164 = arith.maximumf %162, %163 : vector<16x69xf32>
    %165 = arith.maximumf %161, %164 : vector<16x69xf32>
    %166 = arith.truncf %165 : vector<16x69xf32> to vector<16x69xbf16>
    %c0_140 = arith.constant 0 : index
    %c0_141 = arith.constant 0 : index
    %167 = vector.load %arg9[%c0_140, %c0_141] : memref<69x16xbf16, #tpu.memory_space<vmem>>, vector<69x16xbf16>
    %cst_142 = arith.constant dense<0.000000e+00> : vector<16x16xf32>
    %168 = tpu.matmul %166, %167, %cst_142 {dimension_numbers = #tpu.dot_dimension_numbers<[1], [0], [0], [1], [0, 0, 1, 1], [], []>} : vector<16x69xbf16>, vector<69x16xbf16>, vector<16x16xf32> -> vector<16x16xf32>
    %c0_143 = arith.constant 0 : index
    %c0_144 = arith.constant 0 : index
    %c0_145 = arith.constant 0 : index
    %169 = vector.load %arg10[%c0_143, %c0_144, %c0_145] : memref<1x16x16xf32, #tpu.memory_space<vmem>>, vector<1x16x16xf32>
    %170 = vector.shape_cast %169 : vector<1x16x16xf32> to vector<16x16xf32>
    %171 = vector.shape_cast %168 : vector<16x16xf32> to vector<1x16x16xf32>
    tpu.vector_store %arg10[%c0_143, %c0_144, %c0_145], %171 {strides = array<i32>} : memref<1x16x16xf32, #tpu.memory_space<vmem>>, vector<1x16x16xf32>,
    return
  }
  func.func @transform_0(%arg0: i32) -> (i32, i32, i32) {
    %c0_i32 = arith.constant 0 : i32
    %c0_i32_0 = arith.constant 0 : i32
    %c0_i32_1 = arith.constant 0 : i32
    return %arg0, %c0_i32, %c0_i32_0 : i32, i32, i32
  }
  func.func @transform_1(%arg0: i32) -> (i32, i32) {
    %c0_i32 = arith.constant 0 : i32
    %c0_i32_0 = arith.constant 0 : i32
    %c0_i32_1 = arith.constant 0 : i32
    return %c0_i32, %c0_i32_0 : i32, i32
  }
  func.func @transform_2(%arg0: i32) -> (i32, i32) {
    %c0_i32 = arith.constant 0 : i32
    %c0_i32_0 = arith.constant 0 : i32
    %c0_i32_1 = arith.constant 0 : i32
    return %c0_i32, %c0_i32_0 : i32, i32
  }
  func.func @transform_3(%arg0: i32) -> (i32, i32) {
    %c0_i32 = arith.constant 0 : i32
    %c0_i32_0 = arith.constant 0 : i32
    %c0_i32_1 = arith.constant 0 : i32
    return %c0_i32, %c0_i32_0 : i32, i32
  }
  func.func @transform_4(%arg0: i32) -> (i32, i32) {
    %c0_i32 = arith.constant 0 : i32
    %c0_i32_0 = arith.constant 0 : i32
    %c0_i32_1 = arith.constant 0 : i32
    return %c0_i32, %c0_i32_0 : i32, i32
  }
  func.func @transform_5(%arg0: i32) -> (i32, i32) {
    %c0_i32 = arith.constant 0 : i32
    %c0_i32_0 = arith.constant 0 : i32
    %c0_i32_1 = arith.constant 0 : i32
    return %c0_i32, %c0_i32_0 : i32, i32
  }
  func.func @transform_6(%arg0: i32) -> (i32, i32) {
    %c0_i32 = arith.constant 0 : i32
    %c0_i32_0 = arith.constant 0 : i32
    %c0_i32_1 = arith.constant 0 : i32
    return %c0_i32, %c0_i32_0 : i32, i32
  }
  func.func @transform_7(%arg0: i32) -> (i32, i32) {
    %c0_i32 = arith.constant 0 : i32
    %c0_i32_0 = arith.constant 0 : i32
    %c0_i32_1 = arith.constant 0 : i32
    return %c0_i32, %c0_i32_0 : i32, i32
  }
  func.func @transform_8(%arg0: i32) -> (i32, i32) {
    %c0_i32 = arith.constant 0 : i32
    %c0_i32_0 = arith.constant 0 : i32
    %c0_i32_1 = arith.constant 0 : i32
    return %c0_i32, %c0_i32_0 : i32, i32
  }
  func.func @transform_9(%arg0: i32) -> (i32, i32, i32) {
    %c0_i32 = arith.constant 0 : i32
    %c0_i32_0 = arith.constant 0 : i32
    %c0_i32_1 = arith.constant 0 : i32
    return %arg0, %c0_i32, %c0_i32_0 : i32, i32, i32
  }
}

</mosaic_0001>

<bundles_post_ra>
// kernel: model_forward.1
= control target key start
LH: loop header
LB: loop body
LE: loop exit
PB: predicated region body
PF: predicated region fallthrough
CT: control target
= control target key end

     0   :  { %s2630_s30 = smov 0   ;;  %s3536_s0 = inlined_call_operand.vmem [shape: f32[2,16,364], index: 0, kind: input, shape index: {}]   ;;  %s3537_s1 = inlined_call_operand.vmem [shape: f32[8,400], index: 1, kind: input, shape index: {}]   ;;  %s3538_s2 = inlined_call_operand.vmem [shape: f32[8,1], index: 2, kind: input, shape index: {}]   ;;  %s3539_s3 = inlined_call_operand.vmem [shape: f32[16,200], index: 3, kind: input, shape index: {}]   ;;  %s3540_s4 = inlined_call_operand.vmem [shape: f32[16,1], index: 4, kind: input, shape index: {}]   ;;  %s3541_s5 = inlined_call_operand.vmem [shape: f32[1,288], index: 5, kind: input, shape index: {}]   ;;  %s3542_s6 = inlined_call_operand.vmem [shape: f32[1,80], index: 6, kind: input, shape index: {}]   ;;  %s3543_s7 = inlined_call_operand.vmem [shape: bf16[269,124], index: 7, kind: input, shape index: {}]   ;;  %s3544_s8 = inlined_call_operand.vmem [shape: bf16[69,16], index: 8, kind: input, shape index: {}]   ;;  %s3545_s9 = inlined_call_operand.vmem [shape: f32[2,16,16], index: 9, kind: output, shape index: {}]  }
   0x1 LB: > { %s2327_s10 = sadd.s32 4294967295, %s2533_s30   ;;  %p2331_p0 = scmp.ge.s32.totalorder %s2533_s30, 1  ;;  %s2533_s30 = sphi %s2630_s30, %s19_s30  }
   0x2   : > { %p287_p1 = scmp.lt.s32.totalorder %s2533_s30, 3 }
   0x4   : > { %p288_p2 = pnand %p2331_p0, %p287_p1 }
   0x5   : > { %p323_p3 = scmp.lt.s32.totalorder (!%p288_p2), %s2327_s10, 1  ;;  %s2535_s15 = smov (!%p288_p2), 53  }
   0x6   : > { %291 = sbr.rel (%p288_p2) target bundleno = 1956 (0x7a4), region = 56  ;;  %s2536_s16 = smov (!%p288_p2), 74  }
   0x7   : > { %s2537_s17 = smov (!%p288_p2), 54   ;;  %s2538_s18 = smov (!%p288_p2), 88  }
   0x8   : > { %s3546_s19 = smov (!%p288_p2), 108   ;;  %s2540_s20 = smov (!%p288_p2), 55  }
   0x9   : > { %s2541_s21 = smov (!%p288_p2), 89   ;;  %s3551_s22 = smov (!%p288_p2), 109  }
   0xa   : > { %s2543_s23 = smov (!%p288_p2), 56   ;;  %s2544_s24 = smov (!%p288_p2), 90  }
   0xb   : > { %s3584_s10 = smov (!%p323_p3, %s2327_s10), 1  ;;  %s2545_s25 = smov 110   ;;  %vm1273_vm0 = vcmask 433152   ;;  %vm945_vm1 = vcmask 605184   ;;  %vm1232_vm2 = vcmask 441344   ;;  %vm904_vm3 = vcmask 719872  }
   0xc   : > { %s2450_s11 = smul.u32 48, %s3584_s10  ;;  %s2546_s26 = smov 70   ;;  %vm617_vm4 = vcmask 883712   ;;  %vm1191_vm5 = vcmask 449536   ;;  %vm863_vm6 = vcmask 728064   ;;  %vm3560_vm7 = vcmask 891904  }
   0xd   : > { %s2547_s27 = smov 91   ;;  %s2548_s28 = smov 124   ;;  %vm1150_vm8 = vcmask 457728   ;;  %vm3558_vm9 = vcmask 736256   ;;  %vm535_vm10 = vcmask 900096   ;;  %vm3555_vm11 = vcmask 572416  }
   0xe   : > { %s2644_s14 = scalar_lea.vmem %s3536_s0, %s2450_s11  ;;  %s3547_s29 = smov 71   ;;  %vm3557_vm12 = vcmask 744448   ;;  %vm494_vm13 = vcmask 1014784   ;;  %vm3556_vm14 = vcmask 580608   ;;  %vm342_vm15 = vcmask 261120  }
   0xf   : > { %v2647_v0 = vld [vmem:[%s2644_s14 + $0x18] sm:$0xff]  ;;  %v2650_v1 = vld [vmem:[%s2644_s14] sm:$0xff]  ;;  %v2662_v3 = vld [vmem:[%s2644_s14 + $0x8] sm:$0xff]  ;;  %s2550_s11 = smov 92   ;;  %s2551_s12 = smov 125  }
  0x10   : > { %1267 = vrot.lane.b32.xlu0 %v2647_v0, %s2535_s15  ;;  %1261 = vrot.lane.b32.xlu2 %v2650_v1, %s2535_s15  ;;  %v2659_v2 = vld [vmem:[%s2644_s14 + $0x20] sm:$0xff]  ;;  %v2805_v29 = vld [vmem:[%s2644_s14 + $0x28] sm:$0xff]  ;;  %s3549_s13 = smov 72  }
  0x11   : > { %939 = vrot.lane.b32.xlu1 %v2647_v0, %s2536_s16  ;;  %v2832_v39 = vld [vmem:[%s2644_s14 + $0x10] sm:$0xff] }
  0x18   : > { %1269 = vrot.lane.b32.xlu0 %v2659_v2, %s2535_s15  ;;  %1263 = vrot.lane.b32.xlu2 %v2662_v3, %s2535_s15 }
  0x19   : > { %941 = vrot.lane.b32.xlu1 %v2659_v2, %s2536_s16 }
  0x20   : > { %1226 = vrot.lane.b32.xlu2 %v2647_v0, %s2537_s17  ;;  %933 = vrot.lane.b32.xlu0 %v2650_v1, %s2536_s16 }
  0x21   : > { %935 = vrot.lane.b32.xlu1 %v2662_v3, %s2536_s16 }
  0x28   : > { %1228 = vrot.lane.b32.xlu0 %v2659_v2, %s2537_s17  ;;  %900 = vrot.lane.b32.xlu2 %v2659_v2, %s2538_s18 }
  0x29   : > { %898 = vrot.lane.b32.xlu1 %v2647_v0, %s2538_s18 }
  0x30   : > { %1220 = vrot.lane.b32.xlu0 %v2650_v1, %s2537_s17  ;;  %611 = vrot.lane.b32.xlu2 %v2647_v0, %s3546_s19 }
  0x31   : > { %1222 = vrot.lane.b32.xlu1 %v2662_v3, %s2537_s17 }
  0x38   : > { %613 = vrot.lane.b32.xlu0 %v2659_v2, %s3546_s19  ;;  %894 = vrot.lane.b32.xlu2 %v2662_v3, %s2538_s18 }
  0x39   : > { %892 = vrot.lane.b32.xlu1 %v2650_v1, %s2538_s18 }
  0x40   : > { %1185 = vrot.lane.b32.xlu0 %v2647_v0, %s2540_s20  ;;  %605 = vrot.lane.b32.xlu2 %v2650_v1, %s3546_s19 }
  0x41   : > { %1187 = vrot.lane.b32.xlu1 %v2659_v2, %s2540_s20 }
  0x48   : > { %607 = vrot.lane.b32.xlu0 %v2662_v3, %s3546_s19  ;;  %859 = vrot.lane.b32.xlu2 %v2659_v2, %s2541_s21 }
  0x49   : > { %857 = vrot.lane.b32.xlu1 %v2647_v0, %s2541_s21 }
  0x50   : > { %1179 = vrot.lane.b32.xlu0 %v2650_v1, %s2540_s20  ;;  %570 = vrot.lane.b32.xlu2 %v2647_v0, %s3551_s22 }
  0x51   : > { %1181 = vrot.lane.b32.xlu1 %v2662_v3, %s2540_s20 }
  0x58   : > { %572 = vrot.lane.b32.xlu0 %v2659_v2, %s3551_s22  ;;  %853 = vrot.lane.b32.xlu2 %v2662_v3, %s2541_s21 }
  0x59   : > { %851 = vrot.lane.b32.xlu1 %v2650_v1, %s2541_s21 }
  0x60   : > { %1144 = vrot.lane.b32.xlu0 %v2647_v0, %s2543_s23  ;;  %564 = vrot.lane.b32.xlu2 %v2650_v1, %s3551_s22 }
  0x61   : > { %1146 = vrot.lane.b32.xlu1 %v2659_v2, %s2543_s23 }
  0x68   : > { %566 = vrot.lane.b32.xlu0 %v2662_v3, %s3551_s22  ;;  %818 = vrot.lane.b32.xlu2 %v2659_v2, %s2544_s24 }
  0x69   : > { %816 = vrot.lane.b32.xlu1 %v2647_v0, %s2544_s24 }
  0x6a   : > { %v1262_v4 = vpop.permute.xlu2 %1261 }
  0x70   : > { %1138 = vrot.lane.b32.xlu0 %v2650_v1, %s2543_s23  ;;  %529 = vrot.lane.b32.xlu2 %v2647_v0, %s2545_s25 }
  0x71   : > { %1140 = vrot.lane.b32.xlu1 %v2662_v3, %s2543_s23 }
  0x72   : > { %v2736_v5 = vpop.permute.xlu2 %1263 }
  0x73   : > { %v1274_v6 = vsel %vm1273_vm0, %v1262_v4, %v2736_v5 }
  0x78   : > { %531 = vrot.lane.b32.xlu0 %v2659_v2, %s2545_s25  ;;  %812 = vrot.lane.b32.xlu2 %v2662_v3, %s2544_s24 }
  0x79   : > { %810 = vrot.lane.b32.xlu1 %v2650_v1, %s2544_s24 }
  0x7a   : > { %v1227_v7 = vpop.permute.xlu2 %1226 }
  0x80   : > { %1103 = vrot.lane.b32.xlu0 %v2647_v0, %s2546_s26  ;;  %523 = vrot.lane.b32.xlu2 %v2650_v1, %s2545_s25 }
  0x81   : > { %1105 = vrot.lane.b32.xlu1 %v2659_v2, %s2546_s26 }
  0x82   : > { %v1268_v8 = vpop.permute.xlu0 %1267  ;;  %v2752_v9 = vpop.permute.xlu2 %900 }
  0x83   : > { %v940_v10 = vpop.permute.xlu1 %939 }
  0x88   : > { %525 = vrot.lane.b32.xlu0 %v2662_v3, %s2545_s25  ;;  %777 = vrot.lane.b32.xlu2 %v2659_v2, %s2547_s27 }
  0x89   : > { %775 = vrot.lane.b32.xlu1 %v2647_v0, %s2547_s27 }
  0x8a   : > { %v2760_v11 = vpop.permute.xlu0 %1269  ;;  %v612_v12 = vpop.permute.xlu2 %611 }
  0x8b   : > { %v1276_v13 = vsel %vm1273_vm0, %v1268_v8, %v2760_v11  ;;  %v2764_v14 = vpop.permute.xlu1 %941 }
  0x8c   : > { %v948_v15 = vsel %vm945_vm1, %v940_v10, %v2764_v14  ;;  %1535 = vmatpush.msra.mxu2 %v1276_v13 }
  0x8d   : > { %1515 = vmatpush.msra.mxu1 %v948_v15 }
  0x8e   : > { %1536 = vmatpush.msra.mxu2 %v1274_v6 }
  0x90   : > { %1097 = vrot.lane.b32.xlu0 %v2650_v1, %s2546_s26  ;;  %488 = vrot.lane.b32.xlu2 %v2647_v0, %s2548_s28 }
  0x91   : > { %1099 = vrot.lane.b32.xlu1 %v2662_v3, %s2546_s26 }
  0x92   : > { %v934_v16 = vpop.permute.xlu0 %933  ;;  %v2774_v17 = vpop.permute.xlu2 %894 }
  0x93   : > { %v2776_v18 = vpop.permute.xlu1 %935 }
  0x94   : > { %v946_v19 = vsel %vm945_vm1, %v934_v16, %v2776_v18 }
  0x95   : > { %1516 = vmatpush.msra.mxu1 %v946_v19 }
  0x98   : > { %490 = vrot.lane.b32.xlu0 %v2659_v2, %s2548_s28  ;;  %771 = vrot.lane.b32.xlu2 %v2662_v3, %s2547_s27 }
  0x99   : > { %769 = vrot.lane.b32.xlu1 %v2650_v1, %s2547_s27 }
  0x9a   : > { %v2786_v20 = vpop.permute.xlu0 %1228  ;;  %v606_v21 = vpop.permute.xlu2 %605 }
  0x9b   : > { %v1235_v22 = vsel %vm1232_vm2, %v1227_v7, %v2786_v20  ;;  %v899_v23 = vpop.permute.xlu1 %898 }
  0x9c   : > { %v907_v24 = vsel %vm904_vm3, %v899_v23, %v2752_v9  ;;  %1537 = vmatpush.msra.mxu2 %v1235_v22 }
  0x9d   : > { %1517 = vmatpush.msra.mxu1 %v907_v24 }
  0xa0   : > { %1062 = vrot.lane.b32.xlu0 %v2647_v0, %s3547_s29  ;;  %482 = vrot.lane.b32.xlu2 %v2650_v1, %s2548_s28 }
  0xa1   : > { %1064 = vrot.lane.b32.xlu1 %v2659_v2, %s3547_s29 }
  0xa2   : > { %v1221_v25 = vpop.permute.xlu0 %1220  ;;  %v2798_v26 = vpop.permute.xlu2 %859 }
  0xa3   : > { %v2800_v27 = vpop.permute.xlu1 %1222 }
  0xa4   : > { %v1233_v28 = vsel %vm1232_vm2, %v1221_v25, %v2800_v27 }
  0xa5   : > { %1538 = vmatpush.msra.mxu2 %v1233_v28 }
  0xa8   : > { %484 = vrot.lane.b32.xlu0 %v2662_v3, %s2548_s28  ;;  %734 = vrot.lane.b32.xlu2 %v2647_v0, %s2550_s11 }
  0xa9   : > { %615 = vrot.lane.b32.xlu1 %v2805_v29, %s3546_s19 }
  0xaa   : > { %v2813_v30 = vpop.permute.xlu0 %613  ;;  %v571_v31 = vpop.permute.xlu2 %570 }
  0xab   : > { %v893_v32 = vpop.permute.xlu1 %892  ;;  %v620_v33 = vsel %vm617_vm4, %v612_v12, %v2813_v30 }
  0xac   : > { %v905_v34 = vsel %vm904_vm3, %v893_v32, %v2774_v17  ;;  %1495 = vmatpush.msra.mxu0 %v620_v33 }
  0xad   : > { %1518 = vmatpush.msra.mxu1 %v905_v34 }
  0xb0   : > { %736 = vrot.lane.b32.xlu0 %v2659_v2, %s2550_s11  ;;  %1058 = vrot.lane.b32.xlu2 %v2662_v3, %s3547_s29 }
  0xb1   : > { %1056 = vrot.lane.b32.xlu1 %v2650_v1, %s3547_s29  ;;  %s2554_s29 = smov 126  }
  0xb2   : > { %v1186_v35 = vpop.permute.xlu0 %1185  ;;  %v2825_v36 = vpop.permute.xlu2 %853 }
  0xb3   : > { %v2827_v37 = vpop.permute.xlu1 %1187 }
  0xb4   : > { %v1194_v38 = vsel %vm1191_vm5, %v1186_v35, %v2827_v37 }
  0xb5   : > { %1539 = vmatpush.msra.mxu2 %v1194_v38 }
  0xb8   : > { %609 = vrot.lane.b32.xlu2 %v2832_v39, %s3546_s19  ;;  %447 = vrot.lane.b32.xlu0 %v2647_v0, %s2551_s12  ;;  %s3553_s19 = smov 106  }
  0xb9   : > { %449 = vrot.lane.b32.xlu1 %v2659_v2, %s2551_s12 }
  0xba   : > { %v2840_v40 = vpop.permute.xlu0 %607  ;;  %v565_v41 = vpop.permute.xlu2 %564 }
  0xbb   : > { %v858_v42 = vpop.permute.xlu1 %857  ;;  %v618_v43 = vsel %vm617_vm4, %v606_v21, %v2840_v40 }
  0xbc   : > { %v866_v44 = vsel %vm863_vm6, %v858_v42, %v2798_v26  ;;  %1496 = vmatpush.msra.mxu0 %v618_v43 }
  0xbd   : > { %1519 = vmatpush.msra.mxu1 %v866_v44 }
  0xc0   : > { %1021 = vrot.lane.b32.xlu2 %v2647_v0, %s3549_s13  ;;  %728 = vrot.lane.b32.xlu0 %v2650_v1, %s2550_s11 }
  0xc1   : > { %730 = vrot.lane.b32.xlu1 %v2662_v3, %s2550_s11 }
  0xc2   : > { %v1180_v45 = vpop.permute.xlu0 %1179  ;;  %v2852_v46 = vpop.permute.xlu2 %818 }
  0xc3   : > { %v2854_v47 = vpop.permute.xlu1 %1181 }
  0xc4   : > { %v1192_v48 = vsel %vm1191_vm5, %v1180_v45, %v2854_v47 }
  0xc5   : > { %1540 = vmatpush.msra.mxu2 %v1192_v48 }
  0xc8   : > { %1023 = vrot.lane.b32.xlu0 %v2659_v2, %s3549_s13  ;;  %443 = vrot.lane.b32.xlu2 %v2662_v3, %s2551_s12 }
  0xc9   : > { %441 = vrot.lane.b32.xlu1 %v2650_v1, %s2551_s12 }
  0xca   : > { %v2864_v49 = vpop.permute.xlu0 %572  ;;  %v530_v50 = vpop.permute.xlu2 %529 }
  0xcb   : > { %v852_v51 = vpop.permute.xlu1 %851  ;;  %v579_v52 = vsel %vm3560_vm7, %v571_v31, %v2864_v49 }
  0xcc   : > { %v864_v53 = vsel %vm863_vm6, %v852_v51, %v2825_v36  ;;  %1497 = vmatpush.msra.mxu0 %v579_v52 }
  0xcd   : > { %1520 = vmatpush.msra.mxu1 %v864_v53 }
  0xd0   : > { %574 = vrot.lane.b32.xlu0 %v2805_v29, %s3551_s22  ;;  %695 = vrot.lane.b32.xlu2 %v2659_v2, %s3553_s19 }
  0xd1   : > { %693 = vrot.lane.b32.xlu1 %v2647_v0, %s3553_s19 }
  0xd2   : > { %v1145_v54 = vpop.permute.xlu0 %1144  ;;  %v2876_v55 = vpop.permute.xlu2 %812 }
  0xd3   : > { %v2878_v56 = vpop.permute.xlu1 %1146 }
  0xd4   : > { %v1153_v57 = vsel %vm1150_vm8, %v1145_v54, %v2878_v56 }
  0xd5   : > { %1541 = vmatpush.msra.mxu2 %v1153_v57 }
  0xd8   : > { %1015 = vrot.lane.b32.xlu0 %v2650_v1, %s3549_s13  ;;  %406 = vrot.lane.b32.xlu2 %v2647_v0, %s2554_s29 }
  0xd9   : > { %1017 = vrot.lane.b32.xlu1 %v2662_v3, %s3549_s13  ;;  %s2555_s13 = smov 73  }
  0xda   : > { %v2888_v58 = vpop.permute.xlu0 %566  ;;  %v524_v59 = vpop.permute.xlu2 %523 }
  0xdb   : > { %v817_v60 = vpop.permute.xlu1 %816  ;;  %v577_v61 = vsel %vm3560_vm7, %v565_v41, %v2888_v58 }
  0xdc   : > { %v825_v62 = vsel %vm3558_vm9, %v817_v60, %v2852_v46  ;;  %1498 = vmatpush.msra.mxu0 %v577_v61 }
  0xdd   : > { %1521 = vmatpush.msra.mxu1 %v825_v62 }
  0xe0   : > { %408 = vrot.lane.b32.xlu0 %v2659_v2, %s2554_s29  ;;  %687 = vrot.lane.b32.xlu2 %v2650_v1, %s3553_s19 }
  0xe1   : > { %568 = vrot.lane.b32.xlu1 %v2832_v39, %s3551_s22  ;;  %s2556_s22 = smov 107  }
  0xe2   : > { %v1139_v63 = vpop.permute.xlu0 %1138  ;;  %v2900_v4 = vpop.permute.xlu2 %777 }
  0xe3   : > { %v2902_v6 = vpop.permute.xlu1 %1140 }
  0xe4   : > { %v1151_v7 = vsel %vm1150_vm8, %v1139_v63, %v2902_v6 }
  0xe5   : > { %1542 = vmatpush.msra.mxu2 %v1151_v7 }
  0xe8   : > { %689 = vrot.lane.b32.xlu0 %v2662_v3, %s3553_s19  ;;  %982 = vrot.lane.b32.xlu2 %v2659_v2, %s2555_s13  ;;  %s2557_s19 = smov 127  }
  0xe9   : > { %980 = vrot.lane.b32.xlu1 %v2647_v0, %s2555_s13 }
  0xea   : > { %v2912_v8 = vpop.permute.xlu0 %531  ;;  %v489_v10 = vpop.permute.xlu2 %488 }
  0xeb   : > { %v811_v12 = vpop.permute.xlu1 %810  ;;  %v538_v13 = vsel %vm535_vm10, %v530_v50, %v2912_v8 }
  0xec   : > { %v823_v15 = vsel %vm3558_vm9, %v811_v12, %v2876_v55  ;;  %1499 = vmatpush.msra.mxu0 %v538_v13  ;;  %vm412_vm9 = vcmask 1031168  }
  0xed   : > { %1522 = vmatpush.msra.mxu1 %v823_v15 }
  0xf0   : > { %533 = vrot.lane.b32.xlu2 %v2805_v29, %s2545_s25  ;;  %400 = vrot.lane.b32.xlu0 %v2650_v1, %s2554_s29 }
  0xf1   : > { %402 = vrot.lane.b32.xlu1 %v2662_v3, %s2554_s29 }
  0xf2   : > { %v1104_v16 = vpop.permute.xlu0 %1103  ;;  %v2924_v19 = vpop.permute.xlu2 %771 }
  0xf3   : > { %v2926_v21 = vpop.permute.xlu1 %1105 }
  0xf4   : > { %v1112_v22 = vsel %vm3555_vm11, %v1104_v16, %v2926_v21 }
  0xf5   : > { %1543 = vmatpush.msra.mxu2 %v1112_v22 }
  0xf8   : > { %974 = vrot.lane.b32.xlu2 %v2650_v1, %s2555_s13  ;;  %652 = vrot.lane.b32.xlu0 %v2647_v0, %s2556_s22 }
  0xf9   : > { %654 = vrot.lane.b32.xlu1 %v2659_v2, %s2556_s22 }
  0xfa   : > { %v2936_v23 = vpop.permute.xlu0 %525  ;;  %v483_v24 = vpop.permute.xlu2 %482 }
  0xfb   : > { %v776_v25 = vpop.permute.xlu1 %775  ;;  %v536_v28 = vsel %vm535_vm10, %v524_v59, %v2936_v23 }
  0xfc   : > { %v784_v31 = vsel %vm3557_vm12, %v776_v25, %v2900_v4  ;;  %1500 = vmatpush.msra.mxu0 %v536_v28  ;;  %v3045_v28 = vld [vmem:[%s2644_s14 + $0x20] sm:$0xff] }
  0xfd   : > { %1523 = vmatpush.msra.mxu1 %v784_v31 }
 0x100   : > { %976 = vrot.lane.b32.xlu0 %v2662_v3, %s2555_s13  ;;  %367 = vrot.lane.b32.xlu2 %v2659_v2, %s2557_s19 }
 0x101   : > { %365 = vrot.lane.b32.xlu1 %v2647_v0, %s2557_s19 }
 0x102   : > { %v1098_v32 = vpop.permute.xlu0 %1097  ;;  %v735_v33 = vpop.permute.xlu2 %734 }
 0x103   : > { %v2948_v34 = vpop.permute.xlu1 %1099 }
 0x104   : > { %v1110_v35 = vsel %vm3555_vm11, %v1098_v32, %v2948_v34  ;;  %vm740_vm11 = vcmask 752640  }
 0x105   : > { %1544 = vmatpush.msra.mxu2 %v1110_v35 }
 0x108   : > { %527 = vrot.lane.b32.xlu0 %v2832_v39, %s2545_s25  ;;  %648 = vrot.lane.b32.xlu2 %v2662_v3, %s2556_s22  ;;  %s3577_s25 = smov 109  }
 0x109   : > { %646 = vrot.lane.b32.xlu1 %v2650_v1, %s2556_s22 }
 0x10a   : > { %v2958_v2 = vpop.permute.xlu0 %490  ;;  %v2960_v0 = vpop.permute.xlu2 %1058 }
 0x10b   : > { %v770_v38 = vpop.permute.xlu1 %769  ;;  %v497_v41 = vsel %vm494_vm13, %v489_v10, %v2958_v2 }
 0x10c   : > { %v782_v42 = vsel %vm3557_vm12, %v770_v38, %v2924_v19  ;;  %1501 = vmatpush.msra.mxu0 %v497_v41  ;;  %vm3561_vm12 = vcmask 867328   ;;  %v3061_v41 = vld [vmem:[%s2644_s14 + $0x8] sm:$0xff] }
 0x10d   : > { %1524 = vmatpush.msra.mxu1 %v782_v42 }
 0x110   : > { %943 = vrot.lane.b32.xlu0 %v2805_v29, %s2536_s16  ;;  %361 = vrot.lane.b32.xlu2 %v2662_v3, %s2557_s19 }
 0x111   : > { %359 = vrot.lane.b32.xlu1 %v2650_v1, %s2557_s19 }
 0x112   : > { %v1063_v43 = vpop.permute.xlu0 %1062  ;;  %v610_v44 = vpop.permute.xlu2 %609 }
 0x113   : > { %v2972_v45 = vpop.permute.xlu1 %1064  ;;  %v619_v48 = vsel %vm617_vm4, %v2840_v40, %v610_v44  ;;  %630 = vst.msk [vmem:[#allocation2 + $0x160] sm:$0xff] %vm342_vm15, %v610_v44 }
 0x114   : > { %v1071_v50 = vsel %vm3556_vm14, %v1063_v43, %v2972_v45 }
 0x115   : > { %1545 = vmatpush.msra.mxu2 %v1071_v50  ;;  %v3077_v50 = vld [vmem:[%s2644_s14 + $0x18] sm:$0xff] }
 0x118   : > { %492 = vrot.lane.b32.xlu0 %v2805_v29, %s2548_s28  ;;  %1271 = vrot.lane.b32.xlu2 %v2805_v29, %s2535_s15 }
 0x119   : > { %937 = vrot.lane.b32.xlu1 %v2832_v39, %s2536_s16  ;;  %s3562_s16 = smov 71  }
 0x11a   : > { %v2985_v1 = vpop.permute.xlu0 %484  ;;  %v1022_v3 = vpop.permute.xlu2 %1021 }
 0x11b   : > { %v616_v51 = vpop.permute.xlu1 %615  ;;  %v495_v40 = vsel %vm494_vm13, %v483_v24, %v2985_v1 }
 0x11c   : > { %v621_v52 = vsel %vm617_vm4, %v2813_v30, %v616_v51  ;;  %633 = vst.msk [vmem:[#allocation2 + $0x178] sm:$0xff] %vm342_vm15, %v616_v51  ;;  %1502 = vmatpush.msra.mxu0 %v495_v40  ;;  %vm453_vm4 = vcmask 1022976  }
 0x11d   : > { %1575 = vmatpush.msra.mxu3 %v621_v52 }
 0x11f   : > { %1576 = vmatpush.msra.mxu3 %v619_v48 }
 0x120   : > { %486 = vrot.lane.b32.xlu0 %v2832_v39, %s2548_s28  ;;  %1265 = vrot.lane.b32.xlu2 %v2832_v39, %s2535_s15  ;;  %s2558_s15 = smov 52  }
 0x121   : > { %902 = vrot.lane.b32.xlu1 %v2805_v29, %s2538_s18 }
 0x122   : > { %v2998_v53 = vpop.permute.xlu0 %736  ;;  %v3000_v54 = vpop.permute.xlu2 %443 }
 0x123   : > { %v1057_v30 = vpop.permute.xlu1 %1056  ;;  %v743_v57 = vsel %vm740_vm11, %v735_v33, %v2998_v53 }
 0x124   : > { %v1069_v59 = vsel %vm3556_vm14, %v1057_v30, %v2960_v0  ;;  %1525 = vmatpush.msra.mxu1 %v743_v57  ;;  %vm3559_vm14 = vcmask 588800   ;;  %v3093_v30 = vld [vmem:[%s2644_s14] sm:$0xff] }
 0x125   : > { %1546 = vmatpush.msra.mxu2 %v1069_v59 }
 0x128   : > { %451 = vrot.lane.b32.xlu0 %v2805_v29, %s2551_s12  ;;  %1230 = vrot.lane.b32.xlu2 %v2805_v29, %s2537_s17 }
 0x129   : > { %896 = vrot.lane.b32.xlu1 %v2832_v39, %s2538_s18 }
 0x12a   : > { %v448_v60 = vpop.permute.xlu0 %447  ;;  %v3012_v61 = vpop.permute.xlu2 %695 }
 0x12b   : > { %v3014_v62 = vpop.permute.xlu1 %449 }
 0x12c   : > { %v456_v63 = vsel %vm453_vm4, %v448_v60, %v3014_v62 }
 0x12d   : > { %1503 = vmatpush.msra.mxu0 %v456_v63 }
 0x130   : > { %445 = vrot.lane.b32.xlu0 %v2832_v39, %s2551_s12  ;;  %1224 = vrot.lane.b32.xlu2 %v2832_v39, %s2537_s17  ;;  %s3563_s17 = smov 106  }
 0x131   : > { %861 = vrot.lane.b32.xlu1 %v2805_v29, %s2541_s21 }
 0x132   : > { %v729_v7 = vpop.permute.xlu0 %728  ;;  %v407_v10 = vpop.permute.xlu2 %406 }
 0x133   : > { %v3024_v12 = vpop.permute.xlu1 %730 }
 0x134   : > { %v741_v13 = vsel %vm740_vm11, %v729_v7, %v3024_v12 }
 0x135   : > { %1526 = vmatpush.msra.mxu1 %v741_v13 }
 0x138   : > { %410 = vrot.lane.b32.xlu0 %v2805_v29, %s2554_s29  ;;  %1189 = vrot.lane.b32.xlu2 %v2805_v29, %s2540_s20 }
 0x139   : > { %855 = vrot.lane.b32.xlu1 %v2832_v39, %s2541_s21  ;;  %s2560_s21 = smov 1  }
 0x13a   : > { %v3034_v15 = vpop.permute.xlu0 %1023  ;;  %v688_v16 = vpop.permute.xlu2 %687 }
 0x13b   : > { %v1030_v22 = vsel %vm3559_vm14, %v1022_v3, %v3034_v15  ;;  %v442_v24 = vpop.permute.xlu1 %441 }
 0x13c   : > { %v454_v25 = vsel %vm453_vm4, %v442_v24, %v3000_v54  ;;  %1547 = vmatpush.msra.mxu2 %v1030_v22 }
 0x13d   : > { %1504 = vmatpush.msra.mxu0 %v454_v25 }
 0x140   : > { %404 = vrot.lane.b32.xlu0 %v2832_v39, %s2554_s29  ;;  %1183 = vrot.lane.b32.xlu2 %v2832_v39, %s2540_s20  ;;  %s3564_s20 = smov 72  }
 0x141   : > { %820 = vrot.lane.b32.xlu1 %v2805_v29, %s2544_s24 }
 0x142   : > { %v575_v31 = vpop.permute.xlu0 %574  ;;  %v3049_v32 = vpop.permute.xlu2 %982 }
 0x143   : > { %v580_v33 = vsel %vm3560_vm7, %v2864_v49, %v575_v31  ;;  %592 = vst.msk [vmem:[#allocation2 + $0x148] sm:$0xff] %vm342_vm15, %v575_v31  ;;  %v694_v35 = vpop.permute.xlu1 %693 }
 0x144   : > { %v702_v38 = vsel %vm3561_vm12, %v694_v35, %v3012_v61  ;;  %1577 = vmatpush.msra.mxu3 %v580_v33 }
 0x145   : > { %1527 = vmatpush.msra.mxu1 %v702_v38 }
 0x148   : > { %369 = vrot.lane.b32.xlu0 %v2805_v29, %s2557_s19  ;;  %1148 = vrot.lane.b32.xlu2 %v2805_v29, %s2543_s23 }
 0x149   : > { %814 = vrot.lane.b32.xlu1 %v2832_v39, %s2544_s24  ;;  %s2569_s24 = smov 118  }
 0x14a   : > { %v1016_v49 = vpop.permute.xlu0 %1015  ;;  %v534_v42 = vpop.permute.xlu2 %533 }
 0x14b   : > { %v3065_v43 = vpop.permute.xlu1 %1017  ;;  %v539_v44 = vsel %vm535_vm10, %v2912_v8, %v534_v42  ;;  %551 = vst.msk [vmem:[#allocation2 + $0x118] sm:$0xff] %vm342_vm15, %v534_v42 }
 0x14c   : > { %v1028_v48 = vsel %vm3559_vm14, %v1016_v49, %v3065_v43  ;;  %vm986_vm14 = vcmask 596992  }
 0x14d   : > { %1548 = vmatpush.msra.mxu2 %v1028_v48 }
 0x150   : > { %363 = vrot.lane.b32.xlu0 %v2832_v39, %s2557_s19  ;;  %1142 = vrot.lane.b32.xlu2 %v2832_v39, %s2543_s23  ;;  %s2561_s23 = smov 18  }
 0x151   : > { %779 = vrot.lane.b32.xlu1 %v2805_v29, %s2547_s27 }
 0x152   : > { %v3081_v8 = vpop.permute.xlu0 %408  ;;  %v975_v3 = vpop.permute.xlu2 %974 }
 0x153   : > { %v569_v51 = vpop.permute.xlu1 %568  ;;  %v415_v40 = vsel %vm412_vm9, %v407_v10, %v3081_v8 }
 0x154   : > { %v578_v52 = vsel %vm3560_vm7, %v2888_v58, %v569_v51  ;;  %589 = vst.msk [vmem:[#allocation2 + $0x130] sm:$0xff] %vm342_vm15, %v569_v51  ;;  %1505 = vmatpush.msra.mxu0 %v415_v40  ;;  %vm658_vm7 = vcmask 875520  }
 0x155   : > { %1578 = vmatpush.msra.mxu3 %v578_v52 }
 0x157   : > { %1579 = vmatpush.msra.mxu3 %v539_v44 }
 0x158   : > { %773 = vrot.lane.b32.xlu0 %v2832_v39, %s2547_s27  ;;  %738 = vrot.lane.b32.xlu2 %v2805_v29, %s2550_s11  ;;  %s2574_s27 = smov 94  }
 0x159   : > { %1107 = vrot.lane.b32.xlu1 %v2805_v29, %s2546_s26 }
 0x15a   : > { %v3097_v57 = vpop.permute.xlu0 %689  ;;  %v3099_v58 = vpop.permute.xlu2 %367 }
 0x15b   : > { %v981_v59 = vpop.permute.xlu1 %980  ;;  %v700_v60 = vsel %vm3561_vm12, %v688_v16, %v3097_v57  ;;  %vm371_vm12 = vcmask 1039360  }
 0x15c   : > { %v989_v63 = vsel %vm986_vm14, %v981_v59, %v3049_v32  ;;  %1528 = vmatpush.msra.mxu1 %v700_v60 }
 0x15d   : > { %1549 = vmatpush.msra.mxu2 %v989_v63 }
 0x160   : > { %1101 = vrot.lane.b32.xlu0 %v2832_v39, %s2546_s26  ;;  %1312 = vrot.lane.b32.xlu2 %v2805_v29, %s2558_s15  ;;  %s2571_s26 = smov 85  }
 0x161   : > { %1310 = vrot.lane.b32.xlu1 %v3045_v28, %s2558_s15 }
 0x162   : > { %v401_v7 = vpop.permute.xlu0 %400  ;;  %v3111_v10 = vpop.permute.xlu2 %648 }
 0x163   : > { %v3113_v13 = vpop.permute.xlu1 %402 }
 0x164   : > { %v413_v16 = vsel %vm412_vm9, %v401_v7, %v3113_v13 }
 0x165   : > { %1506 = vmatpush.msra.mxu0 %v413_v16 }
 0x168   : > { %732 = vrot.lane.b32.xlu0 %v2832_v39, %s2550_s11  ;;  %1304 = vrot.lane.b32.xlu2 %v3061_v41, %s2558_s15  ;;  %s2563_s11 = smov 105  }
 0x169   : > { %1066 = vrot.lane.b32.xlu1 %v2805_v29, %s3562_s16 }
 0x16a   : > { %v653_v22 = vpop.permute.xlu0 %652  ;;  %v3123_v24 = vpop.permute.xlu2 %361 }
 0x16b   : > { %v3125_v25 = vpop.permute.xlu1 %654 }
 0x16c   : > { %v661_v31 = vsel %vm658_vm7, %v653_v22, %v3125_v25 }
 0x16d   : > { %1529 = vmatpush.msra.mxu1 %v661_v31 }
 0x170   : > { %1306 = vrot.lane.b32.xlu0 %v2832_v39, %s2558_s15  ;;  %697 = vrot.lane.b32.xlu2 %v2805_v29, %s3563_s17 }
 0x171   : > { %1308 = vrot.lane.b32.xlu1 %v3077_v50, %s2558_s15 }
 0x172   : > { %v3135_v33 = vpop.permute.xlu0 %976  ;;  %v1272_v35 = vpop.permute.xlu2 %1271 }
 0x173   : > { %v987_v38 = vsel %vm986_vm14, %v975_v3, %v3135_v33  ;;  %v366_v49 = vpop.permute.xlu1 %365  ;;  %v3141_v42 = vsel %vm1273_vm0, %v2760_v11, %v1272_v35  ;;  %1289 = vst.msk [vmem:[#allocation2 + $0x478] sm:$0xff] %vm342_vm15, %v1272_v35 }
 0x174   : > { %v374_v44 = vsel %vm371_vm12, %v366_v49, %v3099_v58  ;;  %1550 = vmatpush.msra.mxu2 %v987_v38 }
 0x175   : > { %1507 = vmatpush.msra.mxu0 %v374_v44 }
 0x178   : > { %1060 = vrot.lane.b32.xlu0 %v2832_v39, %s3562_s16  ;;  %691 = vrot.lane.b32.xlu2 %v2832_v39, %s3563_s17  ;;  %s2566_s16 = smov 116  }
 0x179   : > { %1302 = vrot.lane.b32.xlu1 %v3093_v30, %s2558_s15  ;;  %s3580_s15 = smov 108  }
 0x17a   : > { %v528_v48 = vpop.permute.xlu0 %527  ;;  %v1266_v3 = vpop.permute.xlu2 %1265 }
 0x17b   : > { %v537_v11 = vsel %vm535_vm10, %v2936_v23, %v528_v48  ;;  %548 = vst.msk [vmem:[#allocation2 + $0x100] sm:$0xff] %vm342_vm15, %v528_v48  ;;  %v647_v51 = vpop.permute.xlu1 %646  ;;  %v3157_v40 = vsel %vm1273_vm0, %v2736_v5, %v1266_v3  ;;  %vm3565_vm0 = vcmask 736256  }
 0x17c   : > { %v659_v52 = vsel %vm658_vm7, %v647_v51, %v3111_v10  ;;  %1580 = vmatpush.msra.mxu3 %v537_v11  ;;  %1286 = vst.msk [vmem:[#allocation2 + $0x460] sm:$0xff] %vm342_vm15, %v1266_v3 }
 0x17d   : > { %1530 = vmatpush.msra.mxu1 %v659_v52 }
 0x180   : > { %1025 = vrot.lane.b32.xlu0 %v2805_v29, %s3564_s20  ;;  %1019 = vrot.lane.b32.xlu2 %v2832_v39, %s3564_s20  ;;  %s2567_s20 = smov 115  }
 0x181   : > { %656 = vrot.lane.b32.xlu1 %v2805_v29, %s2556_s22 }
 0x182   : > { %v944_v23 = vpop.permute.xlu0 %943  ;;  %v1231_v59 = vpop.permute.xlu2 %1230 }
 0x183   : > { %v949_v5 = vsel %vm945_vm1, %v2764_v14, %v944_v23  ;;  %961 = vst.msk [vmem:[#allocation2 + $0x2f8] sm:$0xff] %vm342_vm15, %v944_v23  ;;  %v3173_v60 = vsel %vm1232_vm2, %v2786_v20, %v1231_v59  ;;  %v360_v63 = vpop.permute.xlu1 %359 }
 0x184   : > { %v372_v7 = vsel %vm371_vm12, %v360_v63, %v3123_v24  ;;  %1248 = vst.msk [vmem:[#allocation2 + $0x448] sm:$0xff] %vm342_vm15, %v1231_v59 }
 0x185   : > { %1508 = vmatpush.msra.mxu0 %v372_v7 }
 0x187   : > { %1509 = vmatpush.msra.mxu0 %v3077_v50 }
 0x188   : > { %650 = vrot.lane.b32.xlu0 %v2832_v39, %s2556_s22  ;;  %978 = vrot.lane.b32.xlu2 %v2832_v39, %s2555_s13 }
 0x189   : > { %984 = vrot.lane.b32.xlu1 %v2805_v29, %s2555_s13  ;;  %1510 = vmatpush.msra.mxu0 %v3093_v30  ;;  %s2564_s13 = smov 104  }
 0x18a   : > { %v493_v14 = vpop.permute.xlu0 %492  ;;  %v1225_v20 = vpop.permute.xlu2 %1224 }
 0x18b   : > { %1595 = vmatpush.msrb.mxu0 %v949_v5  ;;  %v498_v16 = vsel %vm494_vm13, %v2958_v2, %v493_v14  ;;  %510 = vst.msk [vmem:[#allocation2 + $0xe8] sm:$0xff] %vm342_vm15, %v493_v14  ;;  %v3191_v50 = vsel %vm1232_vm2, %v2800_v27, %v1225_v20  ;;  %v938_v22 = vpop.permute.xlu1 %937  ;;  %vm3567_vm2 = vcmask 744448  }
 0x18c   : > { %v947_v39 = vsel %vm945_vm1, %v2776_v18, %v938_v22  ;;  %1581 = vmatpush.msra.mxu3 %v498_v16  ;;  %1245 = vst.msk [vmem:[#allocation2 + $0x430] sm:$0xff] %vm342_vm15, %v1225_v20  ;;  %vm3566_vm1 = vmmov %vm3565_vm0 }
 0x18d   : > { %1596 = vmatpush.msrb.mxu0 %v947_v39  ;;  %958 = vst.msk [vmem:[#allocation2 + $0x2e0] sm:$0xff] %vm342_vm15, %v938_v22 }
 0x192   : > { %v487_v29 = vpop.permute.xlu0 %486  ;;  %v1190_v30 = vpop.permute.xlu2 %1189 }
 0x193   : > { %v496_v2 = vsel %vm494_vm13, %v2985_v1, %v487_v29  ;;  %507 = vst.msk [vmem:[#allocation2 + $0xd0] sm:$0xff] %vm342_vm15, %v487_v29  ;;  %v3202_v27 = vsel %vm1191_vm5, %v2827_v37, %v1190_v30  ;;  %v903_v31 = vpop.permute.xlu1 %902  ;;  %vm3574_vm13 = vcmask 580608  }
 0x194   : > { %v908_v18 = vsel %vm904_vm3, %v2752_v9, %v903_v31  ;;  %1582 = vmatpush.msra.mxu3 %v496_v2  ;;  %1207 = vst.msk [vmem:[#allocation2 + $0x418] sm:$0xff] %vm342_vm15, %v1190_v30  ;;  %v1379_v30 = vld [vmem:[#allocation2 + $0x160] sm:$0xff] }
 0x195   : > { %1597 = vmatpush.msrb.mxu0 %v908_v18  ;;  %920 = vst.msk [vmem:[#allocation2 + $0x2c8] sm:$0xff] %vm342_vm15, %v903_v31  ;;  %v1376_v31 = vld [vmem:[#allocation2 + $0x148] sm:$0xff] }
 0x196   : > { %v3285_v18 = vld [vmem:[%s3537_s1 + $0x8] sm:$0xff] }
 0x197   : > { %1531 = vmatmul.f32.vlgmr.msra.gmra.mxu1 %v3285_v18 }
 0x19a   : > { %v452_v35 = vpop.permute.xlu0 %451  ;;  %v1184_v38 = vpop.permute.xlu2 %1183 }
 0x19b   : > { %v457_v1 = vsel %vm453_vm4, %v3014_v62, %v452_v35  ;;  %469 = vst.msk [vmem:[#allocation2 + $0xb8] sm:$0xff] %vm342_vm15, %v452_v35  ;;  %v3213_v37 = vsel %vm1191_vm5, %v2854_v47, %v1184_v38  ;;  %v897_v49 = vpop.permute.xlu1 %896  ;;  %vm3569_vm5 = vcmask 867328  }
 0x19c   : > { %v906_v9 = vsel %vm904_vm3, %v2774_v17, %v897_v49  ;;  %1583 = vmatpush.msra.mxu3 %v457_v1  ;;  %1204 = vst.msk [vmem:[#allocation2 + $0x400] sm:$0xff] %vm342_vm15, %v1184_v38  ;;  %vm3568_vm3 = vmmov %vm3567_vm2  ;;  %v1367_v1 = vld [vmem:[#allocation2 + $0x100] sm:$0xff] }
 0x19d   : > { %1598 = vmatpush.msrb.mxu0 %v906_v9  ;;  %917 = vst.msk [vmem:[#allocation2 + $0x2b0] sm:$0xff] %vm342_vm15, %v897_v49  ;;  %vm3572_vm10 = vmmov %vm3569_vm5 }
 0x1a2   : > { %v446_v44 = vpop.permute.xlu0 %445  ;;  %v1149_v48 = vpop.permute.xlu2 %1148 }
 0x1a3   : > { %v455_v62 = vsel %vm453_vm4, %v3000_v54, %v446_v44  ;;  %466 = vst.msk [vmem:[#allocation2 + $0xa0] sm:$0xff] %vm342_vm15, %v446_v44  ;;  %v3224_v47 = vsel %vm1150_vm8, %v2878_v56, %v1149_v48  ;;  %v862_v3 = vpop.permute.xlu1 %861  ;;  %vm3575_vm4 = vmmov %vm3574_vm13 }
 0x1a4   : > { %v867_v17 = vsel %vm863_vm6, %v2798_v26, %v862_v3  ;;  %1584 = vmatpush.msra.mxu3 %v455_v62  ;;  %1166 = vst.msk [vmem:[#allocation2 + $0x3e8] sm:$0xff] %vm342_vm15, %v1149_v48  ;;  %v1364_v62 = vld [vmem:[#allocation2 + $0xe8] sm:$0xff] }
 0x1a5   : > { %1599 = vmatpush.msrb.mxu0 %v867_v17  ;;  %879 = vst.msk [vmem:[#allocation2 + $0x298] sm:$0xff] %vm342_vm15, %v862_v3  ;;  %v1361_v3 = vld [vmem:[#allocation2 + $0xd0] sm:$0xff]  ;;  %v1358_v17 = vld [vmem:[#allocation2 + $0xb8] sm:$0xff] }
 0x1aa   : > { %v411_v11 = vpop.permute.xlu0 %410  ;;  %v1143_v51 = vpop.permute.xlu2 %1142 }
 0x1ab   : > { %v416_v54 = vsel %vm412_vm9, %v3081_v8, %v411_v11  ;;  %428 = vst.msk [vmem:[#allocation2 + $0x88] sm:$0xff] %vm342_vm15, %v411_v11  ;;  %v3235_v56 = vsel %vm1150_vm8, %v2902_v6, %v1143_v51  ;;  %v856_v52 = vpop.permute.xlu1 %855  ;;  %vm1314_vm8 = vcmask 424960  }
 0x1ac   : > { %v865_v26 = vsel %vm863_vm6, %v2825_v36, %v856_v52  ;;  %1585 = vmatpush.msra.mxu3 %v416_v54  ;;  %1163 = vst.msk [vmem:[#allocation2 + $0x3d0] sm:$0xff] %vm342_vm15, %v1143_v51  ;;  %vm3570_vm6 = vcmask 572416   ;;  %v1355_v51 = vld [vmem:[#allocation2 + $0xa0] sm:$0xff]  ;;  %v2559_v54 = vmov 0  }
 0x1ad   : > { %1600 = vmatpush.msrb.mxu0 %v865_v26  ;;  %876 = vst.msk [vmem:[#allocation2 + $0x280] sm:$0xff] %vm342_vm15, %v856_v52  ;;  %2504 = vset.pattern.permute.xlu0 %v2559_v54 }
 0x1ae   : > { %2515 = vset.pattern.permute.xlu1 %v2559_v54 }
 0x1b2   : > { %v405_v23 = vpop.permute.xlu0 %404  ;;  %v739_v59 = vpop.permute.xlu2 %738 }
 0x1b3   : > { %v414_v8 = vsel %vm412_vm9, %v3113_v13, %v405_v23  ;;  %425 = vst.msk [vmem:[#allocation2 + $0x70] sm:$0xff] %vm342_vm15, %v405_v23  ;;  %v744_v6 = vsel %vm740_vm11, %v2998_v53, %v739_v59  ;;  %v821_v5 = vpop.permute.xlu1 %820  ;;  %vm3571_vm9 = vmmov %vm3570_vm6 }
 0x1b4   : > { %v826_v36 = vsel %vm3565_vm0, %v2852_v46, %v821_v5  ;;  %1586 = vmatpush.msra.mxu3 %v414_v8  ;;  %756 = vst.msk [vmem:[#allocation2 + $0x208] sm:$0xff] %vm342_vm15, %v739_v59  ;;  %v1352_v8 = vld [vmem:[#allocation2 + $0x88] sm:$0xff] }
 0x1b5   : > { %1601 = vmatpush.msrb.mxu0 %v826_v36  ;;  %838 = vst.msk [vmem:[#allocation2 + $0x268] sm:$0xff] %vm342_vm15, %v821_v5  ;;  %v336_v5 = vld [vmem:[%s2644_s14 + $0x10] sm:$0xff] }
 0x1b6   : > { %343 = vst.msk [vmem:[#allocation2 + $0x10] sm:$0xff] %vm342_vm15, %v336_v5 }
 0x1ba   : > { %v370_v63 = vpop.permute.xlu0 %369  ;;  %v1313_v7 = vpop.permute.xlu2 %1312 }
 0x1bb   : > { %v375_v13 = vsel %vm371_vm12, %v3099_v58, %v370_v63  ;;  %387 = vst.msk [vmem:[#allocation2 + $0x58] sm:$0xff] %vm342_vm15, %v370_v63  ;;  %v815_v14 = vpop.permute.xlu1 %814 }
 0x1bc   : > { %v824_v53 = vsel %vm3566_vm1, %v2876_v55, %v815_v14  ;;  %1587 = vmatpush.msra.mxu3 %v375_v13  ;;  %1330 = vst.msk [vmem:[#allocation2 + $0x4a8] sm:$0xff] %vm342_vm15, %v1313_v7  ;;  %v1382_v55 = vld [vmem:[#allocation2 + $0x178] sm:$0xff] }
 0x1bd   : > { %1602 = vmatpush.msrb.mxu0 %v824_v53  ;;  %835 = vst.msk [vmem:[#allocation2 + $0x250] sm:$0xff] %vm342_vm15, %v815_v14 }
 0x1c2   : > { %v364_v46 = vpop.permute.xlu0 %363  ;;  %v3257_v20 = vpop.permute.xlu2 %1304 }
 0x1c3   : > { %v373_v16 = vsel %vm371_vm12, %v3123_v24, %v364_v46  ;;  %384 = vst.msk [vmem:[#allocation2 + $0x40] sm:$0xff] %vm342_vm15, %v364_v46  ;;  %v780_v58 = vpop.permute.xlu1 %779  ;;  %v3270_v24 = vld [vmem:[%s3537_s1 + $0x10] sm:$0xff]  ;;  %vm3573_vm12 = vcmask 588800   ;;  %v1430_v46 = vld [vmem:[#allocation2 + $0x2f8] sm:$0xff] }
 0x1c4   : > { %v785_v22 = vsel %vm3567_vm2, %v2900_v4, %v780_v58  ;;  %1588 = vmatpush.msra.mxu3 %v373_v16  ;;  %797 = vst.msk [vmem:[#allocation2 + $0x238] sm:$0xff] %vm342_vm15, %v780_v58  ;;  %1551 = vmatmul.f32.vlgmr.msra.gmra.mxu2 %v3270_v24  ;;  %v3339_v16 = vld [vmem:[%s3537_s1 + $0x18] sm:$0xff]  ;;  %v1427_v58 = vld [vmem:[#allocation2 + $0x2e0] sm:$0xff]  ;;  %vm3576_vm0 = vmmov %vm3573_vm12  ;;  %vm1756_vm2 = vcmask 7168  }
 0x1c5   : > { %1603 = vmatpush.msrb.mxu0 %v785_v22 }
 0x1c6   : > { %1589 = vmatpush.msra.mxu3 %v3045_v28 }
 0x1c8   : > { %1590 = vmatpush.msra.mxu3 %v3061_v41 }
 0x1ca   : > { %1655 = vmatpush.msrb.mxu3 %v1382_v55  ;;  %v774_v39 = vpop.permute.xlu0 %773  ;;  %v698_v29 = vpop.permute.xlu2 %697  ;;  %v1343_v63 = vld [vmem:[#allocation2 + $0x40] sm:$0xff]  ;;  %v1337_v55 = vld [vmem:[#allocation2 + $0x10] sm:$0xff] }
 0x1cb   : > { %v783_v4 = vsel %vm3568_vm3, %v2924_v19, %v774_v39  ;;  %794 = vst.msk [vmem:[#allocation2 + $0x220] sm:$0xff] %vm342_vm15, %v774_v39  ;;  %v703_v28 = vsel %vm3569_vm5, %v3012_v61, %v698_v29  ;;  %v1108_v41 = vpop.permute.xlu1 %1107  ;;  %v1373_v19 = vld [vmem:[#allocation2 + $0x130] sm:$0xff]  ;;  %v1370_v61 = vld [vmem:[#allocation2 + $0x118] sm:$0xff]  ;;  %vm1939_vm3 = vcmask 1045504   ;;  %vm1940_vm5 = vcmask 1046528  }
 0x1cc   : > { %1656 = vmatpush.msrb.mxu3 %v1379_v30  ;;  %v3280_v2 = vsel %vm3570_vm6, %v2926_v21, %v1108_v41  ;;  %1604 = vmatpush.msrb.mxu0 %v783_v4  ;;  %715 = vst.msk [vmem:[#allocation2 + $0x1d8] sm:$0xff] %vm342_vm15, %v698_v29  ;;  %v3292_v21 = vld [vmem:[%s3537_s1] sm:$0xff]  ;;  %v1421_v29 = vld [vmem:[#allocation2 + $0x2b0] sm:$0xff]  ;;  %vm1774_vm6 = vcmask 146432  }
 0x1cd   : > { %1125 = vst.msk [vmem:[#allocation2 + $0x3b8] sm:$0xff] %vm342_vm15, %v1108_v41  ;;  %1511 = vmatmul.f32.vlgmr.msra.gmra.mxu0 %v3292_v21  ;;  %1591 = vmatmul.f32.vlgmr.msra.gmra.mxu3 %v3292_v21  ;;  %v1418_v41 = vld [vmem:[#allocation2 + $0x298] sm:$0xff] }
 0x1ce   : > { %1657 = vmatpush.msrb.mxu3 %v1376_v31  ;;  %1605 = vmatpush.msrb.mxu0 %v744_v6  ;;  %v339_v6 = vld [vmem:[%s2644_s14 + $0x28] sm:$0xff]  ;;  %v1415_v31 = vld [vmem:[#allocation2 + $0x280] sm:$0xff]  ;;  %s2565_s14 = smov 98  }
 0x1cf   : > { %346 = vst.msk [vmem:[#allocation2 + $0x28] sm:$0xff] %vm342_vm15, %v339_v6  ;;  %v1735_v6 = vld [vmem:[%s3541_s5] sm:$0x7] }
 0x1d0   : > { %1658 = vmatpush.msrb.mxu3 %v1373_v19 }
 0x1d2   : > { %1659 = vmatpush.msrb.mxu3 %v1370_v61  ;;  %v1102_v35 = vpop.permute.xlu0 %1101  ;;  %v692_v38 = vpop.permute.xlu2 %691 }
 0x1d3   : > { %v3299_v49 = vsel %vm3571_vm9, %v2948_v34, %v1102_v35  ;;  %1122 = vst.msk [vmem:[#allocation2 + $0x3a0] sm:$0xff] %vm342_vm15, %v1102_v35  ;;  %v701_v9 = vsel %vm3572_vm10, %v3097_v57, %v692_v38  ;;  %v1311_v44 = vpop.permute.xlu1 %1310  ;;  %v1485_v57 = vld [vmem:[%s3538_s2] sm:$0xff]  ;;  %v1406_v35 = vld [vmem:[#allocation2 + $0x238] sm:$0xff]  ;;  %vm3578_vm9 = vcmask 891904  }
 0x1d4   : > { %1660 = vmatpush.msrb.mxu3 %v1367_v1  ;;  %v1318_v48 = vsel %vm1314_vm8, %v1311_v44, %v1313_v7  ;;  %712 = vst.msk [vmem:[#allocation2 + $0x1c0] sm:$0xff] %vm342_vm15, %v692_v38  ;;  %1488 = vperm.xlu0 %2504, %v1485_v57   ;;  %v1478_v1 = vld [vmem:[#allocation2 + $0x478] sm:$0xff]  ;;  %vm3579_vm10 = vmmov %vm3578_vm9 }
 0x1d5   : > { %1649 = vmatpush.msrb.mxu2 %v1318_v48  ;;  %v1463_v48 = vld [vmem:[#allocation2 + $0x400] sm:$0xff] }
 0x1d6   : > { %1661 = vmatpush.msrb.mxu3 %v1364_v62  ;;  %v1340_v22 = vld [vmem:[#allocation2 + $0x28] sm:$0xff]  ;;  %v1457_v62 = vld [vmem:[#allocation2 + $0x3d0] sm:$0xff] }
 0x1d8   : > { %1662 = vmatpush.msrb.mxu3 %v1361_v3  ;;  %v1454_v3 = vld [vmem:[#allocation2 + $0x3b8] sm:$0xff] }
 0x1da   : > { %1663 = vmatpush.msrb.mxu3 %v1358_v17  ;;  %v733_v34 = vpop.permute.xlu0 %732  ;;  %v1020_v11 = vpop.permute.xlu2 %1019  ;;  %v1484_v17 = vld [vmem:[#allocation2 + $0x4a8] sm:$0xff] }
 0x1db   : > { %v742_v52 = vsel %vm740_vm11, %v3024_v12, %v733_v34  ;;  %753 = vst.msk [vmem:[#allocation2 + $0x1f0] sm:$0xff] %vm342_vm15, %v733_v34  ;;  %v3316_v26 = vsel %vm3573_vm12, %v3065_v43, %v1020_v11  ;;  %v1067_v23 = vpop.permute.xlu1 %1066  ;;  %v1349_v12 = vld [vmem:[#allocation2 + $0x70] sm:$0xff]  ;;  %v1346_v43 = vld [vmem:[#allocation2 + $0x58] sm:$0xff]  ;;  %vm1491_vm11 = vcmask 130048   ;;  %vm1985_vm12 = vcmask 654336  }
 0x1dc   : > { %1664 = vmatpush.msrb.mxu3 %v1355_v51  ;;  %v3320_v59 = vsel %vm3574_vm13, %v2972_v45, %v1067_v23  ;;  %1606 = vmatpush.msrb.mxu0 %v742_v52  ;;  %1040 = vst.msk [vmem:[#allocation2 + $0x340] sm:$0xff] %vm342_vm15, %v1020_v11  ;;  %vm3581_vm13 = vmmov %vm3576_vm0 }
 0x1dd   : > { %1084 = vst.msk [vmem:[#allocation2 + $0x388] sm:$0xff] %vm342_vm15, %v1067_v23 }
 0x1de   : > { %1665 = vmatpush.msrb.mxu3 %v1352_v8  ;;  %1607 = vmatpush.msrb.mxu0 %v703_v28 }
 0x1e0   : > { %1666 = vmatpush.msrb.mxu3 %v1349_v12  ;;  %1608 = vmatpush.msrb.mxu0 %v701_v9  ;;  %v1391_v9 = vld [vmem:[#allocation2 + $0x1c0] sm:$0xff] }
 0x1e2   : > { %1667 = vmatpush.msrb.mxu3 %v1346_v43  ;;  %v1307_v36 = vpop.permute.xlu0 %1306  ;;  %v979_v45 = vpop.permute.xlu2 %978  ;;  %v1397_v38 = vld [vmem:[#allocation2 + $0x1f0] sm:$0xff] }
 0x1e3   : > { %v1316_v7 = vsel %vm1314_vm8, %v3257_v20, %v1307_v36  ;;  %1327 = vst.msk [vmem:[#allocation2 + $0x490] sm:$0xff] %vm342_vm15, %v1307_v36  ;;  %v3333_v13 = vsel %vm986_vm14, %v3135_v33, %v979_v45  ;;  %v1309_v14 = vpop.permute.xlu1 %1308  ;;  %v1424_v33 = vld [vmem:[#allocation2 + $0x2c8] sm:$0xff]  ;;  %v1439_v52 = vld [vmem:[#allocation2 + $0x340] sm:$0xff] }
 0x1e4   : > { %1668 = vmatpush.msrb.mxu3 %v1343_v63  ;;  %v1317_v53 = vsel %vm1314_vm8, %v1309_v14, %v1311_v44  ;;  %1650 = vmatpush.msrb.mxu2 %v1316_v7  ;;  %999 = vst.msk [vmem:[#allocation2 + $0x310] sm:$0xff] %vm342_vm15, %v979_v45  ;;  %v1469_v44 = vld [vmem:[#allocation2 + $0x430] sm:$0xff]  ;;  %v1448_v11 = vld [vmem:[#allocation2 + $0x388] sm:$0xff] }
 0x1e5   : > { %1569 = vmatpush.msrb.mxu1 %v1317_v53  ;;  %2336 = vmatmul.msk.f32.vlgmr.msrb.gmra.mxu2 %vm1491_vm11, %v3339_v16 }
 0x1e6   : > { %1675 = vmatpush.msra.mxu2 %v1430_v46  ;;  %1669 = vmatpush.msrb.mxu3 %v1340_v22 }
 0x1e8   : > { %1676 = vmatpush.msra.mxu2 %v1427_v58  ;;  %1670 = vmatpush.msrb.mxu3 %v1337_v55 }
 0x1e9   : > { %1671 = vmatmul.f32.vlgmr.msrb.gmra.mxu3 %v3292_v21 }
 0x1ea   : > { %1677 = vmatpush.msra.mxu2 %v1424_v33  ;;  %v1061_v39 = vpop.permute.xlu0 %1060  ;;  %v1481_v34 = vld [vmem:[#allocation2 + $0x490] sm:$0xff] }
 0x1eb   : > { %v3346_v30 = vsel %vm3575_vm4, %v2960_v0, %v1061_v39  ;;  %1081 = vst.msk [vmem:[#allocation2 + $0x370] sm:$0xff] %vm342_vm15, %v1061_v39  ;;  %v1303_v4 = vpop.permute.xlu1 %1302  ;;  %v1412_v0 = vld [vmem:[#allocation2 + $0x268] sm:$0xff]  ;;  %v1433_v23 = vld [vmem:[#allocation2 + $0x310] sm:$0xff]  ;;  %vm3582_vm4 = vmmov %vm3576_vm0 }
 0x1ec   : > { %1678 = vmatpush.msra.mxu2 %v1421_v29  ;;  %v1315_v28 = vsel %vm1314_vm8, %v1303_v4, %v3257_v20  ;;  %v1409_v20 = vld [vmem:[#allocation2 + $0x250] sm:$0xff]  ;;  %vm1935_vm8 = vcmask 105472  }
 0x1ed   : > { %1570 = vmatpush.msrb.mxu1 %v1315_v28 }
 0x1ee   : > { %1679 = vmatpush.msra.mxu2 %v1418_v41  ;;  %2335 = vmatmul.msk.f32.vlgmr.msrb.gmra.mxu1 %vm1491_vm11, %v3339_v16 }
 0x1ef   : > { %1615 = vmatpush.msra.mxu1 %v3141_v42 }
 0x1f0   : > { %1680 = vmatpush.msra.mxu2 %v1415_v31 }
 0x1f1   : > { %1616 = vmatpush.msra.mxu1 %v3157_v40  ;;  %v1403_v40 = vld [vmem:[#allocation2 + $0x220] sm:$0xff] }
 0x1f2   : > { %1681 = vmatpush.msra.mxu2 %v1412_v0  ;;  %v1026_v19 = vpop.permute.xlu0 %1025  ;;  %v1445_v51 = vld [vmem:[#allocation2 + $0x370] sm:$0xff] }
 0x1f3   : > { %1617 = vmatpush.msra.mxu1 %v3173_v60  ;;  %v1031_v21 = vsel %vm3576_vm0, %v3034_v15, %v1026_v19  ;;  %1043 = vst.msk [vmem:[#allocation2 + $0x358] sm:$0xff] %vm342_vm15, %v1026_v19  ;;  %v657_v61 = vpop.permute.xlu1 %656  ;;  %v1400_v15 = vld [vmem:[#allocation2 + $0x208] sm:$0xff]  ;;  %vm2249_vm0 = vcmask 1041408  }
 0x1f4   : > { %1682 = vmatpush.msra.mxu2 %v1409_v20  ;;  %v662_v42 = vsel %vm658_vm7, %v3125_v25, %v657_v61  ;;  %674 = vst.msk [vmem:[#allocation2 + $0x1a8] sm:$0xff] %vm342_vm15, %v657_v61 }
 0x1f5   : > { %1618 = vmatpush.msra.mxu1 %v3191_v50  ;;  %1609 = vmatpush.msrb.mxu0 %v662_v42 }
 0x1f6   : > { %1683 = vmatpush.msra.mxu2 %v1406_v35 }
 0x1f7   : > { %1619 = vmatpush.msra.mxu1 %v3202_v27 }
 0x1f8   : > { %1684 = vmatpush.msra.mxu2 %v1403_v40 }
 0x1f9   : > { %1620 = vmatpush.msra.mxu1 %v3213_v37  ;;  %v1394_v37 = vld [vmem:[#allocation2 + $0x1d8] sm:$0xff] }
 0x1fa   : > { %1685 = vmatpush.msra.mxu2 %v1400_v15  ;;  %v651_v60 = vpop.permute.xlu0 %650  ;;  %v1442_v57 = vld [vmem:[#allocation2 + $0x358] sm:$0xff] }
 0x1fb   : > { %1621 = vmatpush.msra.mxu1 %v3224_v47  ;;  %v660_v25 = vsel %vm658_vm7, %v3111_v10, %v651_v60  ;;  %671 = vst.msk [vmem:[#allocation2 + $0x190] sm:$0xff] %vm342_vm15, %v651_v60  ;;  %v985_v50 = vpop.permute.xlu1 %984  ;;  %v1475_v10 = vld [vmem:[#allocation2 + $0x460] sm:$0xff]  ;;  %v1388_v47 = vld [vmem:[#allocation2 + $0x1a8] sm:$0xff]  ;;  %vm1736_vm7 = vcmp.gt.f32.partialorder %v1735_v6, 0.0 }
 0x1fc   : > { %1686 = vmatpush.msra.mxu2 %v1397_v38  ;;  %v990_v27 = vsel %vm986_vm14, %v3049_v32, %v985_v50  ;;  %1610 = vmatpush.msrb.mxu0 %v660_v25  ;;  %1002 = vst.msk [vmem:[#allocation2 + $0x328] sm:$0xff] %vm342_vm15, %v985_v50  ;;  %v1472_v32 = vld [vmem:[#allocation2 + $0x448] sm:$0xff]  ;;  %v1737_v14 = vsel %vm1736_vm7, 1, %v2559_v54  ;;  %vm2250_vm7 = vcmask 1042432  }
 0x1fd   : > { %1622 = vmatpush.msra.mxu1 %v3235_v56  ;;  %1611 = vmatmul.f32.vlgmr.msrb.gmra.mxu0 %v3285_v18  ;;  %v1740_v31 = vperm.slane %v1737_v14, 2  ;;  %v2434_v6 = vld [vmem:[%s3543_s7 + $0x28] sm:$0xff] }
 0x1fe   : > { %1687 = vmatpush.msra.mxu2 %v1394_v37  ;;  %1695 = vmatpush.msra.mxu0 %v1478_v1 }
 0x1ff   : > { %1623 = vmatpush.msra.mxu1 %v3280_v2  ;;  %v1466_v2 = vld [vmem:[#allocation2 + $0x418] sm:$0xff]  ;;  %vm1743_vm1 = vcmp.eq.s32.totalorder %v1740_v31, 1 }
 0x200   : > { %1688 = vmatpush.msra.mxu2 %v1391_v9  ;;  %1696 = vmatpush.msra.mxu0 %v1475_v10  ;;  %v2436_v9 = vld [vmem:[%s3543_s7 + $0x38] sm:$0xff] }
 0x201   : > { %1624 = vmatpush.msra.mxu1 %v3299_v49  ;;  %v1460_v49 = vld [vmem:[#allocation2 + $0x3e8] sm:$0xff]  ;;  %v2444_v10 = vld [vmem:[%s3543_s7 + $0x78] sm:$0xff]  ;;  %1946 = vmatpush.bf16.msra.mxu3 %v2436_v9 }
 0x202   : > { %1689 = vmatpush.msra.mxu2 %v1388_v47  ;;  %1697 = vmatpush.msra.mxu0 %v1472_v32  ;;  %v1385_v56 = vld [vmem:[#allocation2 + $0x190] sm:$0xff]  ;;  %v2404_v47 = vld [vmem:[%s3543_s7 + $0x80] sm:$0xf]  ;;  %v2445_v32 = vld [vmem:[%s3543_s7 + $0x80] sm:$0x70] }
 0x203   : > { %1625 = vmatpush.msra.mxu1 %v3320_v59 }
 0x204   : > { %1690 = vmatpush.msra.mxu2 %v1385_v56  ;;  %1698 = vmatpush.msra.mxu0 %v1469_v44  ;;  %v2405_v56 = vor.u32 %v2445_v32, %v2404_v47  ;;  %v2562_v44 = vmov 65535  }
 0x205   : > { %1626 = vmatpush.msra.mxu1 %v3346_v30  ;;  %1691 = vmatmul.f32.vlgmr.msra.gmra.mxu2 %v3285_v18  ;;  %v1451_v18 = vld [vmem:[#allocation2 + $0x3a0] sm:$0xff] }
 0x206   : > { %1699 = vmatpush.msra.mxu0 %v1466_v2  ;;  %v1941_v2 = vsel %vm1939_vm3, 4294967295, %v2562_v44 }
 0x207   : > { %1627 = vmatpush.msra.mxu1 %v1031_v21 }
 0x208   : > { %1700 = vmatpush.msra.mxu0 %v1463_v48  ;;  %v2435_v48 = vld [vmem:[%s3543_s7 + $0x30] sm:$0xff] }
 0x209   : > { %1628 = vmatpush.msra.mxu1 %v3316_v26  ;;  %v1436_v26 = vld [vmem:[#allocation2 + $0x328] sm:$0xff]  ;;  %1947 = vmatpush.bf16.msra.mxu3 %v2435_v48 }
 0x20a   : > { %1701 = vmatpush.msra.mxu0 %v1460_v49  ;;  %v1942_v49 = vsel %vm1940_vm5, %v1941_v2, 0 }
 0x20b   : > { %1629 = vmatpush.msra.mxu1 %v990_v27 }
 0x20c   : > { %1702 = vmatpush.msra.mxu0 %v1457_v62  ;;  %v2443_v62 = vld [vmem:[%s3543_s7 + $0x70] sm:$0xff] }
 0x20d   : > { %1630 = vmatpush.msra.mxu1 %v3333_v13  ;;  %1948 = vmatpush.bf16.msra.mxu3 %v2434_v6 }
 0x20e   : > { %1631 = vmatmul.f32.vlgmr.msra.gmra.mxu1 %v3270_v24  ;;  %1703 = vmatpush.msra.mxu0 %v1454_v3  ;;  %v1944_v3 = vand.u32 %v2405_v56, %v1942_v49 }
 0x20f   : > { %1729 = vmatpush.msrb.mxu1 %v1484_v17 }
 0x210   : > { %1704 = vmatpush.msra.mxu0 %v1451_v18  ;;  %1979 = vmatpush.bf16.msrb.mxu2 %v1944_v3 }
 0x211   : > { %1730 = vmatpush.msrb.mxu1 %v1481_v34 }
 0x212   : > { %1705 = vmatpush.msra.mxu0 %v1448_v11 }
 0x213   : > { %1959 = vmatpush.bf16.msra.mxu1 %v2444_v10 }
 0x214   : > { %1706 = vmatpush.msra.mxu0 %v1445_v51  ;;  %v1532_v59 = vpop.f32.mrf.mxu1 }
 0x216   : > { %1707 = vmatpush.msra.mxu0 %v1442_v57  ;;  %2337 = vmatmul.msk.f32.vlgmr.msrb.gmra.mxu1 %vm1491_vm11, %v3339_v16  ;;  %v1739_v16 = vperm.slane %v1737_v14, 1 }
 0x217   : > { %1960 = vmatpush.bf16.msra.mxu1 %v2443_v62 }
 0x218   : > { %1708 = vmatpush.msra.mxu0 %v1439_v52  ;;  %vm1742_vm15 = vcmp.eq.s32.totalorder %v1739_v16, 1 }
 0x21a   : > { %1709 = vmatpush.msra.mxu0 %v1436_v26 }
 0x21c   : > { %1710 = vmatpush.msra.mxu0 %v1433_v23 }
 0x21d   : > { %1711 = vmatmul.f32.vlgmr.msra.gmra.mxu0 %v3270_v24  ;;  %v1738_v24 = vperm.slane %v1737_v14, 0  ;;  %v2430_v14 = vld [vmem:[%s3543_s7 + $0x8] sm:$0xff] }
 0x21f   : > { %vm1741_vm14 = vcmp.eq.s32.totalorder %v1738_v24, 1  ;;  %v2437_v24 = vld [vmem:[%s3543_s7 + $0x40] sm:$0xff] }
 0x246   : > { %v1489_v8 = vpop.permute.xlu0 %1488 }
 0x247   : > { %v1552_v63 = vpop.f32.mrf.mxu2 }
 0x24a   : > { %v1512_v12 = vpop.f32.mrf.mxu0 }
 0x24b   : > { %v1513_v5 = vadd.f32 %v1512_v12, %v1489_v8 }
 0x24d   : > { %v1533_v45 = vadd.f32 %v1532_v59, %v1513_v5  ;;  %v2442_v5 = vld [vmem:[%s3543_s7 + $0x68] sm:$0xff] }
 0x24e   : > { %1961 = vmatpush.bf16.msra.mxu1 %v2442_v5 }
 0x24f   : > { %v1553_v53 = vadd.f32 %v1552_v63, %v1533_v45  ;;  %v2432_v45 = vld [vmem:[%s3543_s7 + $0x18] sm:$0xff] }
 0x250   : > { %v1592_v36 = vpop.f32.mrf.mxu3  ;;  %v2440_v63 = vld [vmem:[%s3543_s7 + $0x58] sm:$0xff] }
 0x251   : > { %v1593_v7 = vadd.f32 %v1592_v36, %v1489_v8  ;;  %v2441_v36 = vld [vmem:[%s3543_s7 + $0x60] sm:$0xff] }
 0x252   : > { %1962 = vmatpush.bf16.msra.mxu1 %v2441_v36 }
 0x256   : > { %1963 = vmatpush.bf16.msra.mxu1 %v2440_v63 }
 0x268   : > { %v1652_v22 = vpop.f32.mrf.mxu2 }
 0x26b   : > { %v1572_v43 = vpop.f32.mrf.mxu1 }
 0x26c   : > { %v1573_v33 = vadd.f32 %v1572_v43, %v1553_v53  ;;  %v1672_v28 = vpop.f32.mrf.mxu3  ;;  %v2433_v43 = vld [vmem:[%s3543_s7 + $0x20] sm:$0xff]  ;;  %v2438_v53 = vld [vmem:[%s3543_s7 + $0x48] sm:$0xff] }
 0x26d   : > { %v1673_v41 = vadd.f32 %v1672_v28, %v1489_v8  ;;  %1949 = vmatpush.bf16.msra.mxu3 %v2433_v43 }
 0x26e   : > { %v1744_v29 = vsel %vm1741_vm14, %v1573_v33, -1e+30  ;;  %vm2245_vm14 = vcmask 564224  }
 0x271   : > { %1950 = vmatpush.bf16.msra.mxu3 %v2432_v45  ;;  %v2084_v45 = vld [vmem:[%s3539_s3] sm:$0xff] }
 0x27a   : > { %v1612_v13 = vpop.f32.mrf.mxu0 }
 0x27b   : > { %v1613_v46 = vadd.f32 %v1612_v13, %v1593_v7  ;;  %v2431_v7 = vld [vmem:[%s3543_s7 + $0x10] sm:$0xff] }
 0x27c   : > { %v2439_v13 = vld [vmem:[%s3543_s7 + $0x50] sm:$0xff]  ;;  %1951 = vmatpush.bf16.msra.mxu3 %v2431_v7 }
 0x27d   : > { %1964 = vmatpush.bf16.msra.mxu1 %v2439_v13 }
 0x280   : > { %1952 = vmatpush.bf16.msra.mxu3 %v2430_v14 }
 0x281   : > { %1965 = vmatpush.bf16.msra.mxu1 %v2438_v53 }
 0x285   : > { %1966 = vmatpush.bf16.msra.mxu1 %v2437_v24 }
 0x288   : > { %v1692_v54 = vpop.f32.mrf.mxu2 }
 0x289   : > { %v1693_v0 = vadd.f32 %v1692_v54, %v1673_v41 }
 0x28b   : > { %v1632_v58 = vpop.f32.mrf.mxu1 }
 0x28c   : > { %v1633_v55 = vadd.f32 %v1632_v58, %v1613_v46  ;;  %v2429_v46 = vld [vmem:[%s3543_s7] sm:$0xff] }
 0x28d   : > { %1953 = vmatpush.bf16.msra.mxu3 %v2429_v46  ;;  %v2086_v46 = vld [vmem:[%s3539_s3 + $0x10] sm:$0xff] }
 0x28e   : > { %v1653_v39 = vadd.f32 %v1652_v22, %v1633_v55 }
 0x290   : > { %v1745_v30 = vsel %vm1742_vm15, %v1653_v39, -1e+30 }
 0x291   : > { %v2505_v4 = vpack.i.bf16 %v1745_v30, %v1744_v29 }
 0x293   : > { %2506 = vrot.lane.b32.xlu1 %v2505_v4, %s2560_s21  ;;  %v1732_v20 = vpop.f32.mrf.mxu1 }
 0x29a   : > { %v1712_v19 = vpop.f32.mrf.mxu0 }
 0x29b   : > { %v1713_v21 = vadd.f32 %v1712_v19, %v1693_v0  ;;  %v2113_v0 = vld [vmem:[%s3540_s4] sm:$0xff] }
 0x29d   : > { %v1733_v61 = vadd.f32 %v1732_v20, %v1713_v21 }
 0x29f   : > { %v1746_v42 = vsel %vm1743_vm1, %v1733_v61, -1e+30 }
 0x2a0   : > { %1754 = vrot.lane.b32.xlu2 %v1746_v42, %s2560_s21 }
 0x2fa   : > { %v1755_v60 = vpop.permute.xlu2 %1754 }
 0x305   : > { %v2507_v35 = vpop.permute.xlu1 %2506 }
 0x306   : > { %v2509_v40 = vunpack.i.h.bf16 %v2507_v35  ;;  %v2508_v15 = vunpack.i.l.bf16 %v2507_v35 }
 0x308   : > { %v1758_v38 = vsel %vm1756_vm2, %v2509_v40, %v1755_v60  ;;  %v1757_v25 = vsel %vm1756_vm2, %v2508_v15, %v2509_v40  ;;  %v1762_v50 = vmax.f32 %v1744_v29, %v2508_v15 }
 0x309   : > { %v1764_v27 = vmax.f32 %v1746_v42, %v1758_v38  ;;  %v1763_v37 = vmax.f32 %v1745_v30, %v1757_v25 }
 0x30b   : > { %v2510_v1 = vpack.i.bf16 %v1763_v37, %v1762_v50  ;;  %1772 = vrot.lane.b32.xlu2 %v1764_v27, %s2561_s23 }
 0x30d   : > { %2511 = vrot.lane.b32.xlu1 %v2510_v1, %s2561_s23  ;;  %s2568_s23 = smov 114  }
 0x365   : > { %v1773_v11 = vpop.permute.xlu2 %1772 }
 0x37f   : > { %v2512_v17 = vpop.permute.xlu1 %2511 }
 0x380   : > { %v2514_v18 = vunpack.i.h.bf16 %v2512_v17  ;;  %v2513_v34 = vunpack.i.l.bf16 %v2512_v17 }
 0x382   : > { %v1776_v51 = vsel %vm1774_vm6, %v2514_v18, %v1773_v11  ;;  %v1775_v57 = vsel %vm1774_vm6, %v2513_v34, %v2514_v18  ;;  %v1780_v52 = vmax.f32 %v1762_v50, %v2513_v34 }
 0x383   : > { %v1782_v26 = vmax.f32 %v1764_v27, %v1776_v51  ;;  %v1781_v23 = vmax.f32 %v1763_v37, %v1775_v57 }
 0x384   : > { %v1783_v59 = vpack.c.bf16 %v1780_v52, %v1780_v52 }
 0x385   : > { %v1785_v8 = vpack.c.bf16 %v1782_v26, %v1782_v26  ;;  %v1784_v12 = vpack.c.bf16 %v1781_v23, %v1781_v23 }
 0x386   : > { %1823 = vrot.lane.b32.xlu0 %v1783_v59, %s3577_s25 }
 0x387   : > { %1827 = vrot.lane.b32.xlu2 %v1785_v8, %s3577_s25  ;;  %1825 = vrot.lane.b32.xlu1 %v1784_v12, %s3577_s25  ;;  %s2570_s25 = smov 117   ;;  %v2114_v8 = vld [vmem:[%s3540_s4 + $0x8] sm:$0xff] }
 0x3e1   : > { %v1828_v16 = vpop.permute.xlu2 %1827 }
 0x3e2   : > { %2406 = vmatmul.msk.bf16.vlgmr.msrb.gmra.mxu2 %vm1935_vm8, %v1828_v16 }
 0x3f8   : > { %v1824_v58 = vpop.permute.xlu0 %1823 }
 0x3f9   : > { %v1826_v33 = vpop.permute.xlu1 %1825 }
 0x3fa   : > { %v1830_v22 = vsel %vm3578_vm9, %v1824_v58, %v1826_v33  ;;  %v1831_v55 = vsel %vm3579_vm10, %v1826_v33, %v1828_v16  ;;  %v2085_v33 = vld [vmem:[%s3539_s3 + $0x8] sm:$0xff] }
 0x3fb   : > { %1954 = vmatmul.bf16.vlgmr.msra.gmra.mxu3 %v1830_v22  ;;  %1967 = vmatmul.bf16.vlgmr.msra.gmra.mxu1 %v1831_v55  ;;  %v2087_v55 = vld [vmem:[%s3539_s3 + $0x18] sm:$0xff] }
 0x465   : > { %v1981_v39 = vpop.f32.mrf.mxu2 }
 0x46d   : > { %v1983_v29 = vpop.f32.mrf.mxu2 }
 0x478   : > { %v1968_v30 = vpop.f32.mrf.mxu1 }
 0x47e   : > { %v1955_v4 = vpop.f32.mrf.mxu3 }
 0x47f   : > { %v1969_v28 = vadd.f32 %v1968_v30, %v1955_v4 }
 0x480   : > { %v1970_v41 = vpop.f32.mrf.mxu1 }
 0x481   : > { %v1982_v54 = vadd.f32 %v1981_v39, %v1969_v28 }
 0x483   : > { %2036 = vrot.lane.b32.xlu2 %v1982_v54, %s2563_s11  ;;  %2040 = vrot.lane.b32.xlu1 %v1982_v54, %s2564_s13  ;;  %1986 = vst.msk [vmem:[#allocation3] sm:$0xff] %vm1985_vm12, %v1982_v54  ;;  %s2576_s11 = smov 97   ;;  %s2577_s13 = smov 96  }
 0x484   : > { %2044 = vrot.lane.b32.xlu0 %v1982_v54, %s2565_s14  ;;  %s2578_s14 = smov 95  }
 0x486   : > { %v1957_v31 = vpop.f32.mrf.mxu3 }
 0x48a   : > { %v2088_v63 = vld [vmem:[#allocation3] sm:$0xff] }
 0x48b   : > { %2024 = vrot.lane.b32.xlu2 %v1982_v54, %s3580_s15  ;;  %2028 = vrot.lane.b32.xlu1 %v1982_v54, %s2556_s22  ;;  %s2572_s22 = smov 84  }
 0x48c   : > { %2032 = vrot.lane.b32.xlu0 %v1982_v54, %s3563_s17  ;;  %s2573_s17 = smov 86  }
 0x493   : > { %2012 = vrot.lane.b32.xlu2 %v1982_v54, %s2566_s16  ;;  %2016 = vrot.lane.b32.xlu1 %v1982_v54, %s2567_s20 }
 0x494   : > { %2020 = vrot.lane.b32.xlu0 %v1982_v54, %s2568_s23  ;;  %s2428_s23 = sshll.u32 %s3584_s10, 4 }
 0x49b   : > { %2000 = vrot.lane.b32.xlu2 %v1982_v54, %s2548_s28  ;;  %2004 = vrot.lane.b32.xlu1 %v1982_v54, %s2569_s24  ;;  %s2575_s28 = smov 87  }
 0x49c   : > { %2008 = vrot.lane.b32.xlu0 %v1982_v54, %s2570_s25 }
 0x4a3   : > { %2076 = vrot.lane.b32.xlu2 %v1982_v54, %s2571_s26  ;;  %1996 = vrot.lane.b32.xlu1 %v1982_v54, %s2551_s12 }
 0x4a4   : > { %2080 = vrot.lane.b32.xlu0 %v1982_v54, %s2572_s22  ;;  %s332_s22 = scalar_lea.vmem %s3545_s9, %s2428_s23 }
 0x4ab   : > { %1988 = vrot.lane.b32.xlu2 %v1982_v54, %s2557_s19  ;;  %2072 = vrot.lane.b32.xlu1 %v1982_v54, %s2573_s17 }
 0x4ac   : > { %1992 = vrot.lane.b32.xlu0 %v1982_v54, %s2554_s29 }
 0x4b3   : > { %2060 = vrot.lane.b32.xlu2 %v1982_v54, %s2574_s27  ;;  %2064 = vrot.lane.b32.xlu1 %v1982_v54, %s2538_s18 }
 0x4b4   : > { %2068 = vrot.lane.b32.xlu0 %v1982_v54, %s2575_s28 }
 0x4bb   : > { %2048 = vrot.lane.b32.xlu2 %v1982_v54, %s2576_s11  ;;  %2052 = vrot.lane.b32.xlu1 %v1982_v54, %s2577_s13  ;;  %s2579_s11 = smov 10  }
 0x4bc   : > { %2056 = vrot.lane.b32.xlu0 %v1982_v54, %s2578_s14 }
 0x4c3   : > { %2122 = vperm.xlu1 %2515, %v2114_v8  }
 0x4c4   : > { %2117 = vperm.xlu0 %2504, %v2113_v0  }
 0x4dd   : > { %v2037_v19 = vpop.permute.xlu2 %2036 }
 0x4de   : > { %2039 = vst.msk [vmem:[#allocation3 + $0x68] sm:$0xff] %vm1985_vm12, %v2037_v19 }
 0x4e5   : > { %v2025_v20 = vpop.permute.xlu2 %2024  ;;  %v2101_v50 = vld [vmem:[#allocation3 + $0x68] sm:$0xff] }
 0x4e6   : > { %2027 = vst.msk [vmem:[#allocation3 + $0x50] sm:$0xff] %vm1985_vm12, %v2025_v20  ;;  %v2526_v20 = vld [vmem:[%s3542_s6] ss:$0 sm:$0xff] }
 0x4ed   : > { %v2013_v21 = vpop.permute.xlu2 %2012  ;;  %v2098_v47 = vld [vmem:[#allocation3 + $0x50] sm:$0xff] }
 0x4ee   : > { %2015 = vst.msk [vmem:[#allocation3 + $0x38] sm:$0xff] %vm1985_vm12, %v2013_v21 }
 0x4f5   : > { %v2001_v61 = vpop.permute.xlu2 %2000  ;;  %v2041_v42 = vpop.permute.xlu1 %2040  ;;  %v2095_v62 = vld [vmem:[#allocation3 + $0x38] sm:$0xff] }
 0x4f6   : > { %2003 = vst.msk [vmem:[#allocation3 + $0x20] sm:$0xff] %vm1985_vm12, %v2001_v61  ;;  %v2045_v35 = vpop.permute.xlu0 %2044 }
 0x4f7   : > { %2043 = vst.msk [vmem:[#allocation3 + $0x70] sm:$0xff] %vm1985_vm12, %v2041_v42 }
 0x4f8   : > { %2047 = vst.msk [vmem:[#allocation3 + $0x78] sm:$0xff] %vm1985_vm12, %v2045_v35 }
 0x4fd   : > { %v2077_v40 = vpop.permute.xlu2 %2076  ;;  %v2029_v15 = vpop.permute.xlu1 %2028  ;;  %v2092_v51 = vld [vmem:[#allocation3 + $0x20] sm:$0xff] }
 0x4fe   : > { %2079 = vst.msk [vmem:[#allocation3 + $0xb8] sm:$0xff] %vm1985_vm12, %v2077_v40  ;;  %v2033_v60 = vpop.permute.xlu0 %2032  ;;  %v2102_v25 = vld [vmem:[#allocation3 + $0x70] sm:$0xff] }
 0x4ff   : > { %2031 = vst.msk [vmem:[#allocation3 + $0x58] sm:$0xff] %vm1985_vm12, %v2029_v15  ;;  %v2103_v38 = vld [vmem:[#allocation3 + $0x78] sm:$0xff] }
 0x500   : > { %2035 = vst.msk [vmem:[#allocation3 + $0x60] sm:$0xff] %vm1985_vm12, %v2033_v60  ;;  %2131 = vmatpush.msra.mxu2 %v2103_v38 }
 0x502   : > { %2132 = vmatpush.msra.mxu2 %v2102_v25 }
 0x504   : > { %2133 = vmatpush.msra.mxu2 %v2101_v50 }
 0x505   : > { %v1989_v27 = vpop.permute.xlu2 %1988  ;;  %v2017_v37 = vpop.permute.xlu1 %2016  ;;  %v2111_v59 = vld [vmem:[#allocation3 + $0xb8] sm:$0xff] }
 0x506   : > { %1991 = vst.msk [vmem:[#allocation3 + $0x8] sm:$0xff] %vm1985_vm12, %v1989_v27  ;;  %v2021_v1 = vpop.permute.xlu0 %2020  ;;  %v2099_v10 = vld [vmem:[#allocation3 + $0x58] sm:$0xff] }
 0x507   : > { %2019 = vst.msk [vmem:[#allocation3 + $0x40] sm:$0xff] %vm1985_vm12, %v2017_v37  ;;  %v2100_v9 = vld [vmem:[#allocation3 + $0x60] sm:$0xff]  ;;  %v2214_v37 = vld [vmem:[%s3544_s8 + $0x20] sm:$0x7] }
 0x508   : > { %2023 = vst.msk [vmem:[#allocation3 + $0x48] sm:$0xff] %vm1985_vm12, %v2021_v1  ;;  %2134 = vmatpush.msra.mxu2 %v2100_v9  ;;  %v2235_v1 = vunpack.c.l.b16 %v2214_v37  ;;  %v2251_v9 = vsel %vm2249_vm0, 4294967295, %v2562_v44  ;;  %v2446_v44 = vld [vmem:[%s3544_s8] sm:$0xff] }
 0x50a   : > { %2135 = vmatpush.msra.mxu2 %v2099_v10  ;;  %v2252_v10 = vsel %vm2250_vm7, %v2251_v9, 0 }
 0x50c   : > { %2136 = vmatpush.msra.mxu2 %v2098_v47  ;;  %v2240_v47 = vpack.c.b16 %v2235_v1, %v2235_v1 }
 0x50d   : > { %v2061_v32 = vpop.permute.xlu2 %2060  ;;  %v2005_v56 = vpop.permute.xlu1 %2004  ;;  %v2089_v36 = vld [vmem:[#allocation3 + $0x8] sm:$0xff] }
 0x50e   : > { %2063 = vst.msk [vmem:[#allocation3 + $0x98] sm:$0xff] %vm1985_vm12, %v2061_v32  ;;  %v2009_v2 = vpop.permute.xlu0 %2008  ;;  %v2096_v49 = vld [vmem:[#allocation3 + $0x40] sm:$0xff]  ;;  %v2254_v32 = vand.u32 %v2252_v10, %v2240_v47 }
 0x50f   : > { %2007 = vst.msk [vmem:[#allocation3 + $0x28] sm:$0xff] %vm1985_vm12, %v2005_v56  ;;  %v2097_v48 = vld [vmem:[#allocation3 + $0x48] sm:$0xff] }
 0x510   : > { %2011 = vst.msk [vmem:[#allocation3 + $0x30] sm:$0xff] %vm1985_vm12, %v2009_v2  ;;  %2137 = vmatpush.msra.mxu2 %v2097_v48  ;;  %2259 = vmatpush.bf16.msrb.mxu3 %v2254_v32  ;;  %v2449_v56 = vld [vmem:[%s3544_s8 + $0x18] sm:$0xff]  ;;  %v2448_v2 = vld [vmem:[%s3544_s8 + $0x10] sm:$0xff]  ;;  %v2447_v48 = vld [vmem:[%s3544_s8 + $0x8] sm:$0xff] }
 0x512   : > { %2138 = vmatpush.msra.mxu2 %v2096_v49 }
 0x514   : > { %2139 = vmatpush.msra.mxu2 %v2095_v62  ;;  %2260 = vmatpush.bf16.msrb.mxu3 %v2449_v56 }
 0x515   : > { %v2049_v3 = vpop.permute.xlu2 %2048  ;;  %v1997_v17 = vpop.permute.xlu1 %1996  ;;  %v2107_v24 = vld [vmem:[#allocation3 + $0x98] sm:$0xff] }
 0x516   : > { %2051 = vst.msk [vmem:[#allocation3 + $0x80] sm:$0xff] %vm1985_vm12, %v2049_v3  ;;  %v2081_v18 = vpop.permute.xlu0 %2080  ;;  %v2093_v11 = vld [vmem:[#allocation3 + $0x28] sm:$0xff] }
 0x517   : > { %1999 = vst.msk [vmem:[#allocation3 + $0x18] sm:$0xff] %vm1985_vm12, %v1997_v17  ;;  %v2094_v34 = vld [vmem:[#allocation3 + $0x30] sm:$0xff] }
 0x518   : > { %2083 = vst.msk [vmem:[#allocation3 + $0xc0] sm:$0xff] %vm1985_vm12, %v2081_v18  ;;  %2140 = vmatpush.msra.mxu2 %v2094_v34  ;;  %2261 = vmatpush.bf16.msrb.mxu3 %v2448_v2 }
 0x51a   : > { %2141 = vmatpush.msra.mxu2 %v2093_v11 }
 0x51c   : > { %2142 = vmatpush.msra.mxu2 %v2092_v51  ;;  %2262 = vmatpush.bf16.msrb.mxu3 %v2447_v48 }
 0x51d   : > { %v2073_v57 = vpop.permute.xlu1 %2072  ;;  %v2104_v22 = vld [vmem:[#allocation3 + $0x80] sm:$0xff] }
 0x51e   : > { %2075 = vst.msk [vmem:[#allocation3 + $0xb0] sm:$0xff] %vm1985_vm12, %v2073_v57  ;;  %v1993_v52 = vpop.permute.xlu0 %1992  ;;  %v2091_v26 = vld [vmem:[#allocation3 + $0x18] sm:$0xff] }
 0x51f   : > { %1995 = vst.msk [vmem:[#allocation3 + $0x10] sm:$0xff] %vm1985_vm12, %v1993_v52  ;;  %2143 = vmatpush.msra.mxu2 %v2091_v26  ;;  %v2112_v23 = vld [vmem:[#allocation3 + $0xc0] sm:$0xff] }
 0x520   : > { %2161 = vmatpush.msrb.mxu0 %v2112_v23  ;;  %2263 = vmatpush.bf16.msrb.mxu3 %v2446_v44 }
 0x522   : > { %2162 = vmatpush.msrb.mxu0 %v2111_v59 }
 0x525   : > { %v2065_v12 = vpop.permute.xlu1 %2064  ;;  %v2110_v6 = vld [vmem:[#allocation3 + $0xb0] sm:$0xff] }
 0x526   : > { %2067 = vst.msk [vmem:[#allocation3 + $0xa0] sm:$0xff] %vm1985_vm12, %v2065_v12  ;;  %v2069_v5 = vpop.permute.xlu0 %2068  ;;  %v2090_v43 = vld [vmem:[#allocation3 + $0x10] sm:$0xff]  ;;  %2163 = vmatpush.msrb.mxu0 %v2110_v6 }
 0x527   : > { %2071 = vst.msk [vmem:[#allocation3 + $0xa8] sm:$0xff] %vm1985_vm12, %v2069_v5  ;;  %2144 = vmatpush.msra.mxu2 %v2090_v43 }
 0x529   : > { %2145 = vmatpush.msra.mxu2 %v2089_v36 }
 0x52b   : > { %2146 = vmatpush.msra.mxu2 %v2088_v63 }
 0x52c   : > { %2147 = vmatmul.f32.vlgmr.msra.gmra.mxu2 %v2084_v45 }
 0x52d   : > { %v2053_v7 = vpop.permute.xlu1 %2052  ;;  %v2108_v53 = vld [vmem:[#allocation3 + $0xa0] sm:$0xff] }
 0x52e   : > { %2055 = vst.msk [vmem:[#allocation3 + $0x88] sm:$0xff] %vm1985_vm12, %v2053_v7  ;;  %v2057_v13 = vpop.permute.xlu0 %2056  ;;  %v2109_v14 = vld [vmem:[#allocation3 + $0xa8] sm:$0xff] }
 0x52f   : > { %2059 = vst.msk [vmem:[#allocation3 + $0x90] sm:$0xff] %vm1985_vm12, %v2057_v13  ;;  %2164 = vmatpush.msrb.mxu0 %v2109_v14 }
 0x531   : > { %2165 = vmatpush.msrb.mxu0 %v2108_v53 }
 0x533   : > { %2166 = vmatpush.msrb.mxu0 %v2107_v24 }
 0x534   : > { %2150 = vmatmul.f32.gmra.mxu2 %v2086_v46 }
 0x535   : > { %v2105_v58 = vld [vmem:[#allocation3 + $0x88] sm:$0xff]  ;;  %v2123_v4 = vpop.permute.xlu1 %2122 }
 0x536   : > { %v2106_v16 = vld [vmem:[#allocation3 + $0x90] sm:$0xff]  ;;  %v2118_v30 = vpop.permute.xlu0 %2117 }
 0x537   : > { %2167 = vmatpush.msrb.mxu0 %v2106_v16 }
 0x539   : > { %2168 = vmatpush.msrb.mxu0 %v2105_v58 }
 0x53b   : > { %2169 = vmatpush.msrb.mxu0 %v2104_v22 }
 0x53c   : > { %2407 = vmatmul.msk.f32.vlgmr.msrb.gmra.mxu0 %vm3581_vm13, %v2085_v33 }
 0x544   : > { %2408 = vmatmul.msk.f32.gmra.mxu0 %vm3582_vm4, %v2087_v55 }
 0x5af   : > { %v2148_v39 = vpop.f32.mrf.mxu2 }
 0x5b0   : > { %v2149_v41 = vadd.f32 %v2148_v39, %v2118_v30 }
 0x5b7   : > { %v2151_v28 = vpop.f32.mrf.mxu2 }
 0x5b8   : > { %v2152_v31 = vadd.f32 %v2151_v28, %v2123_v4 }
 0x5b9   : > { %v2171_v29 = vpop.f32.mrf.mxu0 }
 0x5ba   : > { %v2172_v54 = vadd.f32 %v2171_v29, %v2149_v41 }
 0x5bc   : > { %v2177_v19 = vmax.f32 %v2172_v54, 0.0 }
 0x5be   : > { %v2183_v42 = vmul.f32 %v2526_v20, %v2177_v19 }
 0x5c1   : > { %v2174_v0 = vpop.f32.mrf.mxu0 }
 0x5c2   : > { %v2175_v21 = vadd.f32 %v2174_v0, %v2152_v31 }
 0x5c4   : > { %v2178_v61 = vmax.f32 %v2175_v21, 0.0 }
 0x5c6   : > { %v2184_v35 = vmul.f32 %v2526_v20, %v2178_v61 }
 0x5c8   : > { %v2516_v40 = vpack.i.bf16 %v2184_v35, %v2183_v42 }
 0x5ca   : > { %2517 = vrot.lane.b32.xlu2 %v2516_v40, %s2560_s21 }
 0x624   : > { %v2518_v15 = vpop.permute.xlu2 %2517 }
 0x625   : > { %v2520_v60 = vunpack.i.h.bf16 %v2518_v15  ;;  %v2519_v38 = vunpack.i.l.bf16 %v2518_v15 }
 0x627   : > { %v2194_v25 = vmax.f32 %v2184_v35, %v2520_v60  ;;  %v2193_v50 = vmax.f32 %v2183_v42, %v2519_v38 }
 0x629   : > { %v2521_v27 = vpack.i.bf16 %v2194_v25, %v2193_v50 }
 0x62b   : > { %2522 = vrot.lane.b32.xlu0 %v2521_v27, %s2579_s11 }
 0x69d   : > { %v2523_v49 = vpop.permute.xlu0 %2522 }
 0x69e   : > { %v2525_v62 = vunpack.i.h.bf16 %v2523_v49  ;;  %v2524_v3 = vunpack.i.l.bf16 %v2523_v49 }
 0x6a0   : > { %v2204_v17 = vmax.f32 %v2194_v25, %v2525_v62  ;;  %v2203_v18 = vmax.f32 %v2193_v50, %v2524_v3 }
 0x6a2   : > { %v2205_v34 = vpack.c.bf16 %v2204_v17, %v2203_v18 }
 0x6a4   : > { %2216 = vrot.lane.b32.xlu1 %v2205_v34, %s2570_s25 }
 0x716   : > { %v2217_v11 = vpop.permute.xlu1 %2216 }
 0x717   : > { %2425 = vmatmul.msk.bf16.vlgmr.msrb.gmra.mxu3 %vm2245_vm14, %v2217_v11 }
 0x79a   : > { %v2265_v51 = vpop.f32.mrf.mxu3 }
 0x79b   : > { %2270 = vst.msk [vmem:[%s332_s22] sm:$0xff] %vm1491_vm11, %v2265_v51 }
 0x7a2   : > { %v2267_v57 = vpop.f32.mrf.mxu3 }
 0x7a3   : > { %2271 = vst.msk [vmem:[%s332_s22 + $0x8] sm:$0xff] %vm1491_vm11, %v2267_v57 }
 0x7a4 PF: > { %s19_s30 = sadd.s32 1, %s2533_s30  }
 0x7a5   : > { %p16_p4 = scmp.ge.s32.totalorder %s19_s30, 4  }
 0x7a7   :  { %18 = sbr.rel (!%p16_p4) target bundleno = 1 (0x1), region = 86 }

</bundles_post_ra>
